<compile_context>
chip_gen: v7x
topology: tpu7x:2x2x1
jax: 0.10.0
libtpu: 0.0.40
codegen_flags: <defaults>
</compile_context>

<pallas_src>
from functools import partial

import jax
import jax.numpy as jnp
from jax import lax
from jax.experimental import pallas as pl
from jax.experimental.pallas import tpu as pltpu

# ---- Module hyper-parameters (mirrors DilatDeConv2d.__init__) ---------------
IN_CH = 4
OUT_CH = 4
KERNEL_SIZE = (2, 3)      # (k_t, k_f)
STRIDE = (1, 2)           # (s_t, s_f)
DILATION = (1, 1)         # (d_t, d_f)
SLICES = (1, -1)          # used by the s_f == 2 branch of forward()

K_T, K_F = KERNEL_SIZE
S_T, S_F = STRIDE
D_T, D_F = DILATION
K_T_EFF = K_T + (K_T - 1) * (D_T - 1)   # effective (dilated) time kernel
K_F_EFF = K_F + (K_F - 1) * (D_F - 1)   # effective (dilated) freq kernel

_MAX_T_TILE = 96   # keep 4 f32 accumulators + patches inside the 64-vreg file


# ---- Pallas kernel -----------------------------------------------------------
def _deconv_kernel(x_ref, w_ref, b_ref, o_ref, slab_ref):
    # x_ref   : (1, C_in, T_in, F)        raw NCHW input, full time extent (VMEM)
    # w_ref   : (C_in*K_T*K_F*C_out,)     spatially flipped weights, flat f32 (SMEM)
    # b_ref   : (C_out,)                  bias (SMEM)
    # o_ref   : (1, C_out, T_TILE, F_out) cropped output tile, F_out = 2F-1 (VMEM)
    # slab_ref: (C_in, T_TILE+1, 2F+1)    zero-upsampled + padded input slab (VMEM)
    c_in = x_ref.shape[1]
    f_in = x_ref.shape[3]
    c_out = o_ref.shape[1]
    t_tile = o_ref.shape[2]
    f_out = o_ref.shape[3]               # == 2*f_in - 1 (crop already applied)
    w_up = 2 * f_in + 1                  # slab width (only the used columns)

    tile = pl.program_id(1)
    r0 = tile * t_tile                   # first output (== input) row of this tile
    halo_start = jnp.maximum(r0 - 1, 0)  # input row feeding the causal kt=0 halo

    # 0/1 scatter matrix S[m, 2m+1] = 1: one tiny MXU matmul per channel does
    # the stride-2 freq zero-upsample + symmetric pad in place of a
    # lane-strided store.  The MXU slot is otherwise idle; VALU is the binding
    # slot, so this is free in the bundle sense.
    row = lax.broadcasted_iota(jnp.int32, (f_in, w_up), 0)
    col = lax.broadcasted_iota(jnp.int32, (f_in, w_up), 1)
    scatter = (col == 2 * row + 1).astype(jnp.float32)

    def upsample(x2d):
        # Exact even if the MXU runs single-pass bf16: the high part is
        # bf16-representable, the residual is ~2^-9 smaller, and every scatter
        # column has at most one nonzero term (no accumulation error).
        x2d = x2d.astype(jnp.float32)
        hi = x2d.astype(jnp.bfloat16).astype(jnp.float32)
        lo = x2d - hi
        return (jnp.dot(hi, scatter, preferred_element_type=jnp.float32)
                + jnp.dot(lo, scatter, preferred_element_type=jnp.float32))

    for ci in range(c_in):
        slab_ref[ci, 1:, :] = upsample(x_ref[0, ci, pl.ds(r0, t_tile), :])
        slab_ref[ci, 0:1, :] = upsample(x_ref[0, ci, pl.ds(halo_start, 1), :])

    @pl.when(tile == 0)
    def _():
        # Global first frame: the causal halo row is ConvTranspose2d's zero pad.
        for ci in range(c_in):
            slab_ref[ci, 0:1, :] = jnp.zeros((1, w_up), jnp.float32)

    # Bias folded into the accumulator init; 96 scalar-broadcast VPU FMAs on
    # whole (t_tile, f_out) slabs (time fully vectorized, no per-row epilogue).
    acc = [jnp.full((t_tile, f_out), b_ref[co], dtype=jnp.float32)
           for co in range(c_out)]
    for ci in range(c_in):
        for kt in range(K_T):
            for kf in range(K_F):
                patch = slab_ref[ci, kt:kt + t_tile, kf:kf + f_out]
                base = ((ci * K_T + kt) * K_F + kf) * c_out
                for co in range(c_out):
                    acc[co] = acc[co] + w_ref[base + co] * patch

    # Lane-dense stores: last dim is freq (f_out), not channels.
    for co in range(c_out):
        o_ref[0, co, :, :] = acc[co].astype(o_ref.dtype)


# ---- Wrapper -----------------------------------------------------------------
def _pick_t_tile(t_out: int) -> int:
    """Cap the per-block time extent so accumulators stay in the vreg file."""
    if t_out <= _MAX_T_TILE:
        return t_out
    for cand in range(_MAX_T_TILE, 47, -8):   # prefer an 8-aligned divisor
        if t_out % cand == 0:
            return cand
    return _MAX_T_TILE                         # fallback: wrapper pads time


@partial(jax.jit, static_argnums=(3,))
def _dilat_deconv2d_fwd(x, w_flat, bias, t_tile):
    B, c_in, T, F = x.shape
    assert c_in == IN_CH, "kernel is specialized to the module's in_channels"
    t_out = T                      # causal crop :-(K_T_EFF-1) of (T+1) deconv rows
    f_out = S_F * F - 1            # symmetric crop 1:-1 of the (2F+1) deconv width

    if t_tile is None:
        t_tile = _pick_t_tile(t_out)
    assert t_tile == t_out or t_tile % 8 == 0, "time tile must be 8-aligned"
    nt = -(-t_out // t_tile)
    t_padded = nt * t_tile

    x_in = x
    if t_padded != T:
        # Rare fallback (no 8-aligned divisor): pad the raw input with zero
        # frames; causality => output rows < t_out are unaffected.
        x_in = jnp.pad(x, ((0, 0), (0, 0), (0, t_padded - T), (0, 0)))
    t_in = x_in.shape[2]

    out = pl.pallas_call(
        _deconv_kernel,
        out_shape=jax.ShapeDtypeStruct((B, OUT_CH, t_padded, f_out), x.dtype),
        grid_spec=pltpu.PrefetchScalarGridSpec(
            num_scalar_prefetch=0,
            grid=(B, nt),
            in_specs=[
                # Full (C, T, F) per batch element; block index ignores the
                # time-tile axis, so it stays resident across inner steps.
                pl.BlockSpec((1, c_in, t_in, F), lambda b, t: (b, 0, 0, 0)),
                pl.BlockSpec(memory_space=pltpu.MemorySpace.SMEM),   # weights
                pl.BlockSpec(memory_space=pltpu.MemorySpace.SMEM),   # bias
            ],
            out_specs=pl.BlockSpec((1, OUT_CH, t_tile, f_out),
                                   lambda b, t: (b, 0, t, 0)),
            scratch_shapes=[
                pltpu.VMEM((c_in, t_tile + 1, S_F * F + 1), jnp.float32)],
        ),
        # batch x time-tiles both parallel: feeds both v7x TensorCores even at
        # B=1; degrades to a cheap serial loop on single-TC v5e/v6e.
        compiler_params=pltpu.CompilerParams(
            dimension_semantics=("parallel", "parallel")),
    )(x_in, w_flat, bias)

    if t_padded != t_out:
        out = out[:, :, :t_out, :]
    return out


def make_dilat_deconv2d(weight, bias):
    """Builds the layer fn; hoists the ConvTranspose2d weight flip/transpose/
    flatten out of the per-call path (done once at parameter load)."""
    c_in, c_out, k_t, k_f = weight.shape
    assert (c_in, c_out) == (IN_CH, OUT_CH), "weight does not match module config"
    assert (k_t, k_f) == KERNEL_SIZE and bias.shape == (OUT_CH,)
    # (ci, co, kt, kf) -> spatially flipped, flattened as [(ci, kt, kf, co)].
    w_flat = jnp.asarray(
        jnp.transpose(weight[:, :, ::-1, ::-1], (0, 2, 3, 1)).reshape(-1),
        jnp.float32)
    bias_f32 = jnp.asarray(bias, jnp.float32)

    def apply(x, t_tile=None):
        return _dilat_deconv2d_fwd(x, w_flat, bias_f32, t_tile)
    return apply


# ---- Pure-JAX reference (for correctness check only) -------------------------
def _reference(x_nchw, weight, bias):
    pad_t = D_T * (K_T - 1)
    pad_f = D_F * (K_F - 1)
    w_oihw = jnp.transpose(weight, (1, 0, 2, 3))[:, :, ::-1, ::-1]
    y = lax.conv_general_dilated(
        x_nchw, w_oihw,
        window_strides=(1, 1),
        padding=((pad_t, pad_t), (pad_f, pad_f)),
        lhs_dilation=(S_T, S_F),
        rhs_dilation=(D_T, D_F),
        dimension_numbers=("NCHW", "OIHW", "NCHW"))
    y = y + bias.reshape(1, -1, 1, 1)
    if K_T_EFF > 1:
        if S_F == 1:
            y = y[:, :, : -(K_T_EFF - 1), 1:-1]
        elif S_F == 2:
            y = y[:, :, : -(K_T_EFF - 1), SLICES[0]:SLICES[1]]
    return y


if __name__ == "__main__":
    key = jax.random.PRNGKey(0)
    k_w, k_b, k_x, k_x2 = jax.random.split(key, 4)

    # Deterministic synthetic parameters (same shapes as nn.ConvTranspose2d).
    weight = jax.random.normal(k_w, (IN_CH, OUT_CH, K_T, K_F), jnp.float32) * 0.1
    bias = jax.random.normal(k_b, (OUT_CH,), jnp.float32) * 0.1
    deconv = make_dilat_deconv2d(weight, bias)

    # (batch=2, channels=4, time=8, freq=16), NCHW: single time tile per batch.
    x = jax.random.normal(k_x, (2, IN_CH, 8, 16), jnp.float32)
    out = jax.block_until_ready(deconv(x))
    ref = jax.block_until_ready(_reference(x, weight, bias))
    assert out.shape == ref.shape, (out.shape, ref.shape)
    assert jnp.allclose(out, ref, atol=1e-4, rtol=1e-4), "single-tile mismatch"

    # Multi-tile path: exercises the causal halo between time tiles and the
    # uneven-tail fallback (40 output rows, forced 16-row tiles -> 3 tiles).
    x2 = jax.random.normal(k_x2, (1, IN_CH, 40, 16), jnp.float32)
    out2 = jax.block_until_ready(deconv(x2, t_tile=16))
    ref2 = jax.block_until_ready(_reference(x2, weight, bias))
    assert out2.shape == ref2.shape, (out2.shape, ref2.shape)
    assert jnp.allclose(out2, ref2, atol=1e-4, rtol=1e-4), "multi-tile mismatch"

    print("KERNEL_OK")
</pallas_src>

<mosaic_0001>
module attributes {stable_mosaic.version = 11 : i64} {
  func.func @_deconv_kernel(%arg0: i32, %arg1: i32, %arg2: memref<1x4x8x16xf32, #tpu.memory_space<vmem>>, %arg3: memref<96xf32, #tpu.memory_space<smem>>, %arg4: memref<4xf32, #tpu.memory_space<smem>>, %arg5: memref<1x4x8x31xf32, #tpu.memory_space<vmem>>, %arg6: memref<4x9x33xf32, #tpu.memory_space<vmem>>) attributes {dimension_semantics = [#tpu.dimension_semantics<parallel>, #tpu.dimension_semantics<parallel>], iteration_bounds = array<i64: 2, 1>, scalar_prefetch = 0 : i64, scratch_operands = 1 : i64, tpu.core_type = #tpu.core_type<tc>, window_params = [{transform_indices = @transform_0, window_bounds = array<i64: 1, 4, 8, 16>}, {transform_indices = @transform_1, window_bounds = array<i64: 96>}, {transform_indices = @transform_2, window_bounds = array<i64: 4>}, {transform_indices = @transform_3, window_bounds = array<i64: 1, 4, 8, 31>}]} {
    %c8_i32 = arith.constant 8 : i32
    %0 = arith.muli %arg1, %c8_i32 : i32
    %c1_i32 = arith.constant 1 : i32
    %1 = arith.subi %0, %c1_i32 : i32
    %c0_i32 = arith.constant 0 : i32
    %2 = arith.maxsi %1, %c0_i32 : i32
    %3 = tpu.iota {dimensions = array<i32: 0>} : vector<16x33xi32>
    %4 = tpu.iota {dimensions = array<i32: 1>} : vector<16x33xi32>
    %c2_i32 = arith.constant 2 : i32
    %5 = vector.broadcast %c2_i32 : i32 to vector<16x33xi32>
    %6 = arith.muli %5, %3 : vector<16x33xi32>
    %c1_i32_0 = arith.constant 1 : i32
    %7 = vector.broadcast %c1_i32_0 : i32 to vector<16x33xi32>
    %8 = arith.addi %6, %7 : vector<16x33xi32>
    %9 = arith.cmpi eq, %4, %8 : vector<16x33xi32>
    %10 = arith.extui %9 : vector<16x33xi1> to vector<16x33xi32>
    %11 = arith.sitofp %10 : vector<16x33xi32> to vector<16x33xf32>
    %c0 = arith.constant 0 : index
    %c0_1 = arith.constant 0 : index
    %12 = arith.index_cast %0 : i32 to index
    %c0_2 = arith.constant 0 : index
    %13 = vector.load %arg2[%c0, %c0_1, %12, %c0_2] : memref<1x4x8x16xf32, #tpu.memory_space<vmem>>, vector<1x1x8x16xf32>
    %14 = vector.shape_cast %13 : vector<1x1x8x16xf32> to vector<8x16xf32>
    %15 = arith.truncf %14 : vector<8x16xf32> to vector<8x16xbf16>
    %16 = arith.extf %15 : vector<8x16xbf16> to vector<8x16xf32>
    %17 = arith.subf %14, %16 : vector<8x16xf32>
    %cst = arith.constant dense<0.000000e+00> : vector<8x33xf32>
    %18 = tpu.matmul %16, %11, %cst {dimension_numbers = #tpu.dot_dimension_numbers<[1], [0], [0], [1], [0, 0, 1, 1], [], []>} : vector<8x16xf32>, vector<16x33xf32>, vector<8x33xf32> -> vector<8x33xf32>
    %cst_3 = arith.constant dense<0.000000e+00> : vector<8x33xf32>
    %19 = tpu.matmul %17, %11, %cst_3 {dimension_numbers = #tpu.dot_dimension_numbers<[1], [0], [0], [1], [0, 0, 1, 1], [], []>} : vector<8x16xf32>, vector<16x33xf32>, vector<8x33xf32> -> vector<8x33xf32>
    %20 = arith.addf %18, %19 : vector<8x33xf32>
    %c0_4 = arith.constant 0 : index
    %c1 = arith.constant 1 : index
    %c0_5 = arith.constant 0 : index
    %21 = vector.load %arg6[%c0_4, %c1, %c0_5] : memref<4x9x33xf32, #tpu.memory_space<vmem>>, vector<1x8x33xf32>
    %22 = vector.shape_cast %21 : vector<1x8x33xf32> to vector<8x33xf32>
    %23 = vector.shape_cast %20 : vector<8x33xf32> to vector<1x8x33xf32>
    tpu.vector_store %arg6[%c0_4, %c1, %c0_5], %23 {strides = array<i32>} : memref<4x9x33xf32, #tpu.memory_space<vmem>>, vector<1x8x33xf32>,
    %c0_6 = arith.constant 0 : index
    %c0_7 = arith.constant 0 : index
    %24 = arith.index_cast %2 : i32 to index
    %c0_8 = arith.constant 0 : index
    %25 = vector.load %arg2[%c0_6, %c0_7, %24, %c0_8] : memref<1x4x8x16xf32, #tpu.memory_space<vmem>>, vector<1x1x1x16xf32>
    %26 = vector.shape_cast %25 : vector<1x1x1x16xf32> to vector<1x16xf32>
    %27 = arith.truncf %26 : vector<1x16xf32> to vector<1x16xbf16>
    %28 = arith.extf %27 : vector<1x16xbf16> to vector<1x16xf32>
    %29 = arith.subf %26, %28 : vector<1x16xf32>
    %cst_9 = arith.constant dense<0.000000e+00> : vector<1x33xf32>
    %30 = tpu.matmul %28, %11, %cst_9 {dimension_numbers = #tpu.dot_dimension_numbers<[1], [0], [0], [1], [0, 0, 1, 1], [], []>} : vector<1x16xf32>, vector<16x33xf32>, vector<1x33xf32> -> vector<1x33xf32>
    %cst_10 = arith.constant dense<0.000000e+00> : vector<1x33xf32>
    %31 = tpu.matmul %29, %11, %cst_10 {dimension_numbers = #tpu.dot_dimension_numbers<[1], [0], [0], [1], [0, 0, 1, 1], [], []>} : vector<1x16xf32>, vector<16x33xf32>, vector<1x33xf32> -> vector<1x33xf32>
    %32 = arith.addf %30, %31 : vector<1x33xf32>
    %c0_11 = arith.constant 0 : index
    %c0_12 = arith.constant 0 : index
    %c0_13 = arith.constant 0 : index
    %33 = vector.load %arg6[%c0_11, %c0_12, %c0_13] : memref<4x9x33xf32, #tpu.memory_space<vmem>>, vector<1x1x33xf32>
    %34 = vector.shape_cast %33 : vector<1x1x33xf32> to vector<1x33xf32>
    %35 = vector.shape_cast %32 : vector<1x33xf32> to vector<1x1x33xf32>
    tpu.vector_store %arg6[%c0_11, %c0_12, %c0_13], %35 {strides = array<i32>} : memref<4x9x33xf32, #tpu.memory_space<vmem>>, vector<1x1x33xf32>,
    %c0_14 = arith.constant 0 : index
    %c1_15 = arith.constant 1 : index
    %36 = arith.index_cast %0 : i32 to index
    %c0_16 = arith.constant 0 : index
    %37 = vector.load %arg2[%c0_14, %c1_15, %36, %c0_16] : memref<1x4x8x16xf32, #tpu.memory_space<vmem>>, vector<1x1x8x16xf32>
    %38 = vector.shape_cast %37 : vector<1x1x8x16xf32> to vector<8x16xf32>
    %39 = arith.truncf %38 : vector<8x16xf32> to vector<8x16xbf16>
    %40 = arith.extf %39 : vector<8x16xbf16> to vector<8x16xf32>
    %41 = arith.subf %38, %40 : vector<8x16xf32>
    %cst_17 = arith.constant dense<0.000000e+00> : vector<8x33xf32>
    %42 = tpu.matmul %40, %11, %cst_17 {dimension_numbers = #tpu.dot_dimension_numbers<[1], [0], [0], [1], [0, 0, 1, 1], [], []>} : vector<8x16xf32>, vector<16x33xf32>, vector<8x33xf32> -> vector<8x33xf32>
    %cst_18 = arith.constant dense<0.000000e+00> : vector<8x33xf32>
    %43 = tpu.matmul %41, %11, %cst_18 {dimension_numbers = #tpu.dot_dimension_numbers<[1], [0], [0], [1], [0, 0, 1, 1], [], []>} : vector<8x16xf32>, vector<16x33xf32>, vector<8x33xf32> -> vector<8x33xf32>
    %44 = arith.addf %42, %43 : vector<8x33xf32>
    %c1_19 = arith.constant 1 : index
    %c1_20 = arith.constant 1 : index
    %c0_21 = arith.constant 0 : index
    %45 = vector.load %arg6[%c1_19, %c1_20, %c0_21] : memref<4x9x33xf32, #tpu.memory_space<vmem>>, vector<1x8x33xf32>
    %46 = vector.shape_cast %45 : vector<1x8x33xf32> to vector<8x33xf32>
    %47 = vector.shape_cast %44 : vector<8x33xf32> to vector<1x8x33xf32>
    tpu.vector_store %arg6[%c1_19, %c1_20, %c0_21], %47 {strides = array<i32>} : memref<4x9x33xf32, #tpu.memory_space<vmem>>, vector<1x8x33xf32>,
    %c0_22 = arith.constant 0 : index
    %c1_23 = arith.constant 1 : index
    %48 = arith.index_cast %2 : i32 to index
    %c0_24 = arith.constant 0 : index
    %49 = vector.load %arg2[%c0_22, %c1_23, %48, %c0_24] : memref<1x4x8x16xf32, #tpu.memory_space<vmem>>, vector<1x1x1x16xf32>
    %50 = vector.shape_cast %49 : vector<1x1x1x16xf32> to vector<1x16xf32>
    %51 = arith.truncf %50 : vector<1x16xf32> to vector<1x16xbf16>
    %52 = arith.extf %51 : vector<1x16xbf16> to vector<1x16xf32>
    %53 = arith.subf %50, %52 : vector<1x16xf32>
    %cst_25 = arith.constant dense<0.000000e+00> : vector<1x33xf32>
    %54 = tpu.matmul %52, %11, %cst_25 {dimension_numbers = #tpu.dot_dimension_numbers<[1], [0], [0], [1], [0, 0, 1, 1], [], []>} : vector<1x16xf32>, vector<16x33xf32>, vector<1x33xf32> -> vector<1x33xf32>
    %cst_26 = arith.constant dense<0.000000e+00> : vector<1x33xf32>
    %55 = tpu.matmul %53, %11, %cst_26 {dimension_numbers = #tpu.dot_dimension_numbers<[1], [0], [0], [1], [0, 0, 1, 1], [], []>} : vector<1x16xf32>, vector<16x33xf32>, vector<1x33xf32> -> vector<1x33xf32>
    %56 = arith.addf %54, %55 : vector<1x33xf32>
    %c1_27 = arith.constant 1 : index
    %c0_28 = arith.constant 0 : index
    %c0_29 = arith.constant 0 : index
    %57 = vector.load %arg6[%c1_27, %c0_28, %c0_29] : memref<4x9x33xf32, #tpu.memory_space<vmem>>, vector<1x1x33xf32>
    %58 = vector.shape_cast %57 : vector<1x1x33xf32> to vector<1x33xf32>
    %59 = vector.shape_cast %56 : vector<1x33xf32> to vector<1x1x33xf32>
    tpu.vector_store %arg6[%c1_27, %c0_28, %c0_29], %59 {strides = array<i32>} : memref<4x9x33xf32, #tpu.memory_space<vmem>>, vector<1x1x33xf32>,
    %c0_30 = arith.constant 0 : index
    %c2 = arith.constant 2 : index
    %60 = arith.index_cast %0 : i32 to index
    %c0_31 = arith.constant 0 : index
    %61 = vector.load %arg2[%c0_30, %c2, %60, %c0_31] : memref<1x4x8x16xf32, #tpu.memory_space<vmem>>, vector<1x1x8x16xf32>
    %62 = vector.shape_cast %61 : vector<1x1x8x16xf32> to vector<8x16xf32>
    %63 = arith.truncf %62 : vector<8x16xf32> to vector<8x16xbf16>
    %64 = arith.extf %63 : vector<8x16xbf16> to vector<8x16xf32>
    %65 = arith.subf %62, %64 : vector<8x16xf32>
    %cst_32 = arith.constant dense<0.000000e+00> : vector<8x33xf32>
    %66 = tpu.matmul %64, %11, %cst_32 {dimension_numbers = #tpu.dot_dimension_numbers<[1], [0], [0], [1], [0, 0, 1, 1], [], []>} : vector<8x16xf32>, vector<16x33xf32>, vector<8x33xf32> -> vector<8x33xf32>
    %cst_33 = arith.constant dense<0.000000e+00> : vector<8x33xf32>
    %67 = tpu.matmul %65, %11, %cst_33 {dimension_numbers = #tpu.dot_dimension_numbers<[1], [0], [0], [1], [0, 0, 1, 1], [], []>} : vector<8x16xf32>, vector<16x33xf32>, vector<8x33xf32> -> vector<8x33xf32>
    %68 = arith.addf %66, %67 : vector<8x33xf32>
    %c2_34 = arith.constant 2 : index
    %c1_35 = arith.constant 1 : index
    %c0_36 = arith.constant 0 : index
    %69 = vector.load %arg6[%c2_34, %c1_35, %c0_36] : memref<4x9x33xf32, #tpu.memory_space<vmem>>, vector<1x8x33xf32>
    %70 = vector.shape_cast %69 : vector<1x8x33xf32> to vector<8x33xf32>
    %71 = vector.shape_cast %68 : vector<8x33xf32> to vector<1x8x33xf32>
    tpu.vector_store %arg6[%c2_34, %c1_35, %c0_36], %71 {strides = array<i32>} : memref<4x9x33xf32, #tpu.memory_space<vmem>>, vector<1x8x33xf32>,
    %c0_37 = arith.constant 0 : index
    %c2_38 = arith.constant 2 : index
    %72 = arith.index_cast %2 : i32 to index
    %c0_39 = arith.constant 0 : index
    %73 = vector.load %arg2[%c0_37, %c2_38, %72, %c0_39] : memref<1x4x8x16xf32, #tpu.memory_space<vmem>>, vector<1x1x1x16xf32>
    %74 = vector.shape_cast %73 : vector<1x1x1x16xf32> to vector<1x16xf32>
    %75 = arith.truncf %74 : vector<1x16xf32> to vector<1x16xbf16>
    %76 = arith.extf %75 : vector<1x16xbf16> to vector<1x16xf32>
    %77 = arith.subf %74, %76 : vector<1x16xf32>
    %cst_40 = arith.constant dense<0.000000e+00> : vector<1x33xf32>
    %78 = tpu.matmul %76, %11, %cst_40 {dimension_numbers = #tpu.dot_dimension_numbers<[1], [0], [0], [1], [0, 0, 1, 1], [], []>} : vector<1x16xf32>, vector<16x33xf32>, vector<1x33xf32> -> vector<1x33xf32>
    %cst_41 = arith.constant dense<0.000000e+00> : vector<1x33xf32>
    %79 = tpu.matmul %77, %11, %cst_41 {dimension_numbers = #tpu.dot_dimension_numbers<[1], [0], [0], [1], [0, 0, 1, 1], [], []>} : vector<1x16xf32>, vector<16x33xf32>, vector<1x33xf32> -> vector<1x33xf32>
    %80 = arith.addf %78, %79 : vector<1x33xf32>
    %c2_42 = arith.constant 2 : index
    %c0_43 = arith.constant 0 : index
    %c0_44 = arith.constant 0 : index
    %81 = vector.load %arg6[%c2_42, %c0_43, %c0_44] : memref<4x9x33xf32, #tpu.memory_space<vmem>>, vector<1x1x33xf32>
    %82 = vector.shape_cast %81 : vector<1x1x33xf32> to vector<1x33xf32>
    %83 = vector.shape_cast %80 : vector<1x33xf32> to vector<1x1x33xf32>
    tpu.vector_store %arg6[%c2_42, %c0_43, %c0_44], %83 {strides = array<i32>} : memref<4x9x33xf32, #tpu.memory_space<vmem>>, vector<1x1x33xf32>,
    %c0_45 = arith.constant 0 : index
    %c3 = arith.constant 3 : index
    %84 = arith.index_cast %0 : i32 to index
    %c0_46 = arith.constant 0 : index
    %85 = vector.load %arg2[%c0_45, %c3, %84, %c0_46] : memref<1x4x8x16xf32, #tpu.memory_space<vmem>>, vector<1x1x8x16xf32>
    %86 = vector.shape_cast %85 : vector<1x1x8x16xf32> to vector<8x16xf32>
    %87 = arith.truncf %86 : vector<8x16xf32> to vector<8x16xbf16>
    %88 = arith.extf %87 : vector<8x16xbf16> to vector<8x16xf32>
    %89 = arith.subf %86, %88 : vector<8x16xf32>
    %cst_47 = arith.constant dense<0.000000e+00> : vector<8x33xf32>
    %90 = tpu.matmul %88, %11, %cst_47 {dimension_numbers = #tpu.dot_dimension_numbers<[1], [0], [0], [1], [0, 0, 1, 1], [], []>} : vector<8x16xf32>, vector<16x33xf32>, vector<8x33xf32> -> vector<8x33xf32>
    %cst_48 = arith.constant dense<0.000000e+00> : vector<8x33xf32>
    %91 = tpu.matmul %89, %11, %cst_48 {dimension_numbers = #tpu.dot_dimension_numbers<[1], [0], [0], [1], [0, 0, 1, 1], [], []>} : vector<8x16xf32>, vector<16x33xf32>, vector<8x33xf32> -> vector<8x33xf32>
    %92 = arith.addf %90, %91 : vector<8x33xf32>
    %c3_49 = arith.constant 3 : index
    %c1_50 = arith.constant 1 : index
    %c0_51 = arith.constant 0 : index
    %93 = vector.load %arg6[%c3_49, %c1_50, %c0_51] : memref<4x9x33xf32, #tpu.memory_space<vmem>>, vector<1x8x33xf32>
    %94 = vector.shape_cast %93 : vector<1x8x33xf32> to vector<8x33xf32>
    %95 = vector.shape_cast %92 : vector<8x33xf32> to vector<1x8x33xf32>
    tpu.vector_store %arg6[%c3_49, %c1_50, %c0_51], %95 {strides = array<i32>} : memref<4x9x33xf32, #tpu.memory_space<vmem>>, vector<1x8x33xf32>,
    %c0_52 = arith.constant 0 : index
    %c3_53 = arith.constant 3 : index
    %96 = arith.index_cast %2 : i32 to index
    %c0_54 = arith.constant 0 : index
    %97 = vector.load %arg2[%c0_52, %c3_53, %96, %c0_54] : memref<1x4x8x16xf32, #tpu.memory_space<vmem>>, vector<1x1x1x16xf32>
    %98 = vector.shape_cast %97 : vector<1x1x1x16xf32> to vector<1x16xf32>
    %99 = arith.truncf %98 : vector<1x16xf32> to vector<1x16xbf16>
    %100 = arith.extf %99 : vector<1x16xbf16> to vector<1x16xf32>
    %101 = arith.subf %98, %100 : vector<1x16xf32>
    %cst_55 = arith.constant dense<0.000000e+00> : vector<1x33xf32>
    %102 = tpu.matmul %100, %11, %cst_55 {dimension_numbers = #tpu.dot_dimension_numbers<[1], [0], [0], [1], [0, 0, 1, 1], [], []>} : vector<1x16xf32>, vector<16x33xf32>, vector<1x33xf32> -> vector<1x33xf32>
    %cst_56 = arith.constant dense<0.000000e+00> : vector<1x33xf32>
    %103 = tpu.matmul %101, %11, %cst_56 {dimension_numbers = #tpu.dot_dimension_numbers<[1], [0], [0], [1], [0, 0, 1, 1], [], []>} : vector<1x16xf32>, vector<16x33xf32>, vector<1x33xf32> -> vector<1x33xf32>
    %104 = arith.addf %102, %103 : vector<1x33xf32>
    %c3_57 = arith.constant 3 : index
    %c0_58 = arith.constant 0 : index
    %c0_59 = arith.constant 0 : index
    %105 = vector.load %arg6[%c3_57, %c0_58, %c0_59] : memref<4x9x33xf32, #tpu.memory_space<vmem>>, vector<1x1x33xf32>
    %106 = vector.shape_cast %105 : vector<1x1x33xf32> to vector<1x33xf32>
    %107 = vector.shape_cast %104 : vector<1x33xf32> to vector<1x1x33xf32>
    tpu.vector_store %arg6[%c3_57, %c0_58, %c0_59], %107 {strides = array<i32>} : memref<4x9x33xf32, #tpu.memory_space<vmem>>, vector<1x1x33xf32>,
    %c0_i32_60 = arith.constant 0 : i32
    %108 = arith.cmpi eq, %arg1, %c0_i32_60 : i32
    %109 = arith.extui %108 : i1 to i32
    %c0_i32_61 = arith.constant 0 : i32
    %110 = arith.cmpi ne, %109, %c0_i32_61 : i32
    scf.if %110 {
      %cst_158 = arith.constant 0.000000e+00 : f32
      %563 = vector.broadcast %cst_158 : f32 to vector<1x33xf32>
      %c0_159 = arith.constant 0 : index
      %c0_160 = arith.constant 0 : index
      %c0_161 = arith.constant 0 : index
      %564 = vector.load %arg6[%c0_159, %c0_160, %c0_161] : memref<4x9x33xf32, #tpu.memory_space<vmem>>, vector<1x1x33xf32>
      %565 = vector.shape_cast %564 : vector<1x1x33xf32> to vector<1x33xf32>
      %566 = vector.shape_cast %563 : vector<1x33xf32> to vector<1x1x33xf32>
      tpu.vector_store %arg6[%c0_159, %c0_160, %c0_161], %566 {strides = array<i32>} : memref<4x9x33xf32, #tpu.memory_space<vmem>>, vector<1x1x33xf32>,
      %cst_162 = arith.constant 0.000000e+00 : f32
      %567 = vector.broadcast %cst_162 : f32 to vector<1x33xf32>
      %c1_163 = arith.constant 1 : index
      %c0_164 = arith.constant 0 : index
      %c0_165 = arith.constant 0 : index
      %568 = vector.load %arg6[%c1_163, %c0_164, %c0_165] : memref<4x9x33xf32, #tpu.memory_space<vmem>>, vector<1x1x33xf32>
      %569 = vector.shape_cast %568 : vector<1x1x33xf32> to vector<1x33xf32>
      %570 = vector.shape_cast %567 : vector<1x33xf32> to vector<1x1x33xf32>
      tpu.vector_store %arg6[%c1_163, %c0_164, %c0_165], %570 {strides = array<i32>} : memref<4x9x33xf32, #tpu.memory_space<vmem>>, vector<1x1x33xf32>,
      %cst_166 = arith.constant 0.000000e+00 : f32
      %571 = vector.broadcast %cst_166 : f32 to vector<1x33xf32>
      %c2_167 = arith.constant 2 : index
      %c0_168 = arith.constant 0 : index
      %c0_169 = arith.constant 0 : index
      %572 = vector.load %arg6[%c2_167, %c0_168, %c0_169] : memref<4x9x33xf32, #tpu.memory_space<vmem>>, vector<1x1x33xf32>
      %573 = vector.shape_cast %572 : vector<1x1x33xf32> to vector<1x33xf32>
      %574 = vector.shape_cast %571 : vector<1x33xf32> to vector<1x1x33xf32>
      tpu.vector_store %arg6[%c2_167, %c0_168, %c0_169], %574 {strides = array<i32>} : memref<4x9x33xf32, #tpu.memory_space<vmem>>, vector<1x1x33xf32>,
      %cst_170 = arith.constant 0.000000e+00 : f32
      %575 = vector.broadcast %cst_170 : f32 to vector<1x33xf32>
      %c3_171 = arith.constant 3 : index
      %c0_172 = arith.constant 0 : index
      %c0_173 = arith.constant 0 : index
      %576 = vector.load %arg6[%c3_171, %c0_172, %c0_173] : memref<4x9x33xf32, #tpu.memory_space<vmem>>, vector<1x1x33xf32>
      %577 = vector.shape_cast %576 : vector<1x1x33xf32> to vector<1x33xf32>
      %578 = vector.shape_cast %575 : vector<1x33xf32> to vector<1x1x33xf32>
      tpu.vector_store %arg6[%c3_171, %c0_172, %c0_173], %578 {strides = array<i32>} : memref<4x9x33xf32, #tpu.memory_space<vmem>>, vector<1x1x33xf32>,
    } else {
    }
    %c0_62 = arith.constant 0 : index
    %111 = memref.load %arg4[%c0_62] : memref<4xf32, #tpu.memory_space<smem>>
    %112 = vector.broadcast %111 : f32 to vector<8x31xf32>
    %c1_63 = arith.constant 1 : index
    %113 = memref.load %arg4[%c1_63] : memref<4xf32, #tpu.memory_space<smem>>
    %114 = vector.broadcast %113 : f32 to vector<8x31xf32>
    %c2_64 = arith.constant 2 : index
    %115 = memref.load %arg4[%c2_64] : memref<4xf32, #tpu.memory_space<smem>>
    %116 = vector.broadcast %115 : f32 to vector<8x31xf32>
    %c3_65 = arith.constant 3 : index
    %117 = memref.load %arg4[%c3_65] : memref<4xf32, #tpu.memory_space<smem>>
    %118 = vector.broadcast %117 : f32 to vector<8x31xf32>
    %c0_66 = arith.constant 0 : index
    %c0_67 = arith.constant 0 : index
    %c0_68 = arith.constant 0 : index
    %119 = vector.load %arg6[%c0_66, %c0_67, %c0_68] : memref<4x9x33xf32, #tpu.memory_space<vmem>>, vector<1x8x31xf32>
    %120 = vector.shape_cast %119 : vector<1x8x31xf32> to vector<8x31xf32>
    %c0_69 = arith.constant 0 : index
    %121 = memref.load %arg3[%c0_69] : memref<96xf32, #tpu.memory_space<smem>>
    %122 = vector.broadcast %121 : f32 to vector<8x31xf32>
    %123 = arith.mulf %122, %120 : vector<8x31xf32>
    %124 = arith.addf %112, %123 : vector<8x31xf32>
    %c1_70 = arith.constant 1 : index
    %125 = memref.load %arg3[%c1_70] : memref<96xf32, #tpu.memory_space<smem>>
    %126 = vector.broadcast %125 : f32 to vector<8x31xf32>
    %127 = arith.mulf %126, %120 : vector<8x31xf32>
    %128 = arith.addf %114, %127 : vector<8x31xf32>
    %c2_71 = arith.constant 2 : index
    %129 = memref.load %arg3[%c2_71] : memref<96xf32, #tpu.memory_space<smem>>
    %130 = vector.broadcast %129 : f32 to vector<8x31xf32>
    %131 = arith.mulf %130, %120 : vector<8x31xf32>
    %132 = arith.addf %116, %131 : vector<8x31xf32>
    %c3_72 = arith.constant 3 : index
    %133 = memref.load %arg3[%c3_72] : memref<96xf32, #tpu.memory_space<smem>>
    %134 = vector.broadcast %133 : f32 to vector<8x31xf32>
    %135 = arith.mulf %134, %120 : vector<8x31xf32>
    %136 = arith.addf %118, %135 : vector<8x31xf32>
    %c0_73 = arith.constant 0 : index
    %c0_74 = arith.constant 0 : index
    %c1_75 = arith.constant 1 : index
    %137 = vector.load %arg6[%c0_73, %c0_74, %c1_75] : memref<4x9x33xf32, #tpu.memory_space<vmem>>, vector<1x8x31xf32>
    %138 = vector.shape_cast %137 : vector<1x8x31xf32> to vector<8x31xf32>
    %c4 = arith.constant 4 : index
    %139 = memref.load %arg3[%c4] : memref<96xf32, #tpu.memory_space<smem>>
    %140 = vector.broadcast %139 : f32 to vector<8x31xf32>
    %141 = arith.mulf %140, %138 : vector<8x31xf32>
    %142 = arith.addf %124, %141 : vector<8x31xf32>
    %c5 = arith.constant 5 : index
    %143 = memref.load %arg3[%c5] : memref<96xf32, #tpu.memory_space<smem>>
    %144 = vector.broadcast %143 : f32 to vector<8x31xf32>
    %145 = arith.mulf %144, %138 : vector<8x31xf32>
    %146 = arith.addf %128, %145 : vector<8x31xf32>
    %c6 = arith.constant 6 : index
    %147 = memref.load %arg3[%c6] : memref<96xf32, #tpu.memory_space<smem>>
    %148 = vector.broadcast %147 : f32 to vector<8x31xf32>
    %149 = arith.mulf %148, %138 : vector<8x31xf32>
    %150 = arith.addf %132, %149 : vector<8x31xf32>
    %c7 = arith.constant 7 : index
    %151 = memref.load %arg3[%c7] : memref<96xf32, #tpu.memory_space<smem>>
    %152 = vector.broadcast %151 : f32 to vector<8x31xf32>
    %153 = arith.mulf %152, %138 : vector<8x31xf32>
    %154 = arith.addf %136, %153 : vector<8x31xf32>
    %c0_76 = arith.constant 0 : index
    %c0_77 = arith.constant 0 : index
    %c2_78 = arith.constant 2 : index
    %155 = vector.load %arg6[%c0_76, %c0_77, %c2_78] : memref<4x9x33xf32, #tpu.memory_space<vmem>>, vector<1x8x31xf32>
    %156 = vector.shape_cast %155 : vector<1x8x31xf32> to vector<8x31xf32>
    %c8 = arith.constant 8 : index
    %157 = memref.load %arg3[%c8] : memref<96xf32, #tpu.memory_space<smem>>
    %158 = vector.broadcast %157 : f32 to vector<8x31xf32>
    %159 = arith.mulf %158, %156 : vector<8x31xf32>
    %160 = arith.addf %142, %159 : vector<8x31xf32>
    %c9 = arith.constant 9 : index
    %161 = memref.load %arg3[%c9] : memref<96xf32, #tpu.memory_space<smem>>
    %162 = vector.broadcast %161 : f32 to vector<8x31xf32>
    %163 = arith.mulf %162, %156 : vector<8x31xf32>
    %164 = arith.addf %146, %163 : vector<8x31xf32>
    %c10 = arith.constant 10 : index
    %165 = memref.load %arg3[%c10] : memref<96xf32, #tpu.memory_space<smem>>
    %166 = vector.broadcast %165 : f32 to vector<8x31xf32>
    %167 = arith.mulf %166, %156 : vector<8x31xf32>
    %168 = arith.addf %150, %167 : vector<8x31xf32>
    %c11 = arith.constant 11 : index
    %169 = memref.load %arg3[%c11] : memref<96xf32, #tpu.memory_space<smem>>
    %170 = vector.broadcast %169 : f32 to vector<8x31xf32>
    %171 = arith.mulf %170, %156 : vector<8x31xf32>
    %172 = arith.addf %154, %171 : vector<8x31xf32>
    %c0_79 = arith.constant 0 : index
    %c1_80 = arith.constant 1 : index
    %c0_81 = arith.constant 0 : index
    %173 = vector.load %arg6[%c0_79, %c1_80, %c0_81] : memref<4x9x33xf32, #tpu.memory_space<vmem>>, vector<1x8x31xf32>
    %174 = vector.shape_cast %173 : vector<1x8x31xf32> to vector<8x31xf32>
    %c12 = arith.constant 12 : index
    %175 = memref.load %arg3[%c12] : memref<96xf32, #tpu.memory_space<smem>>
    %176 = vector.broadcast %175 : f32 to vector<8x31xf32>
    %177 = arith.mulf %176, %174 : vector<8x31xf32>
    %178 = arith.addf %160, %177 : vector<8x31xf32>
    %c13 = arith.constant 13 : index
    %179 = memref.load %arg3[%c13] : memref<96xf32, #tpu.memory_space<smem>>
    %180 = vector.broadcast %179 : f32 to vector<8x31xf32>
    %181 = arith.mulf %180, %174 : vector<8x31xf32>
    %182 = arith.addf %164, %181 : vector<8x31xf32>
    %c14 = arith.constant 14 : index
    %183 = memref.load %arg3[%c14] : memref<96xf32, #tpu.memory_space<smem>>
    %184 = vector.broadcast %183 : f32 to vector<8x31xf32>
    %185 = arith.mulf %184, %174 : vector<8x31xf32>
    %186 = arith.addf %168, %185 : vector<8x31xf32>
    %c15 = arith.constant 15 : index
    %187 = memref.load %arg3[%c15] : memref<96xf32, #tpu.memory_space<smem>>
    %188 = vector.broadcast %187 : f32 to vector<8x31xf32>
    %189 = arith.mulf %188, %174 : vector<8x31xf32>
    %190 = arith.addf %172, %189 : vector<8x31xf32>
    %c0_82 = arith.constant 0 : index
    %c1_83 = arith.constant 1 : index
    %c1_84 = arith.constant 1 : index
    %191 = vector.load %arg6[%c0_82, %c1_83, %c1_84] : memref<4x9x33xf32, #tpu.memory_space<vmem>>, vector<1x8x31xf32>
    %192 = vector.shape_cast %191 : vector<1x8x31xf32> to vector<8x31xf32>
    %c16 = arith.constant 16 : index
    %193 = memref.load %arg3[%c16] : memref<96xf32, #tpu.memory_space<smem>>
    %194 = vector.broadcast %193 : f32 to vector<8x31xf32>
    %195 = arith.mulf %194, %192 : vector<8x31xf32>
    %196 = arith.addf %178, %195 : vector<8x31xf32>
    %c17 = arith.constant 17 : index
    %197 = memref.load %arg3[%c17] : memref<96xf32, #tpu.memory_space<smem>>
    %198 = vector.broadcast %197 : f32 to vector<8x31xf32>
    %199 = arith.mulf %198, %192 : vector<8x31xf32>
    %200 = arith.addf %182, %199 : vector<8x31xf32>
    %c18 = arith.constant 18 : index
    %201 = memref.load %arg3[%c18] : memref<96xf32, #tpu.memory_space<smem>>
    %202 = vector.broadcast %201 : f32 to vector<8x31xf32>
    %203 = arith.mulf %202, %192 : vector<8x31xf32>
    %204 = arith.addf %186, %203 : vector<8x31xf32>
    %c19 = arith.constant 19 : index
    %205 = memref.load %arg3[%c19] : memref<96xf32, #tpu.memory_space<smem>>
    %206 = vector.broadcast %205 : f32 to vector<8x31xf32>
    %207 = arith.mulf %206, %192 : vector<8x31xf32>
    %208 = arith.addf %190, %207 : vector<8x31xf32>
    %c0_85 = arith.constant 0 : index
    %c1_86 = arith.constant 1 : index
    %c2_87 = arith.constant 2 : index
    %209 = vector.load %arg6[%c0_85, %c1_86, %c2_87] : memref<4x9x33xf32, #tpu.memory_space<vmem>>, vector<1x8x31xf32>
    %210 = vector.shape_cast %209 : vector<1x8x31xf32> to vector<8x31xf32>
    %c20 = arith.constant 20 : index
    %211 = memref.load %arg3[%c20] : memref<96xf32, #tpu.memory_space<smem>>
    %212 = vector.broadcast %211 : f32 to vector<8x31xf32>
    %213 = arith.mulf %212, %210 : vector<8x31xf32>
    %214 = arith.addf %196, %213 : vector<8x31xf32>
    %c21 = arith.constant 21 : index
    %215 = memref.load %arg3[%c21] : memref<96xf32, #tpu.memory_space<smem>>
    %216 = vector.broadcast %215 : f32 to vector<8x31xf32>
    %217 = arith.mulf %216, %210 : vector<8x31xf32>
    %218 = arith.addf %200, %217 : vector<8x31xf32>
    %c22 = arith.constant 22 : index
    %219 = memref.load %arg3[%c22] : memref<96xf32, #tpu.memory_space<smem>>
    %220 = vector.broadcast %219 : f32 to vector<8x31xf32>
    %221 = arith.mulf %220, %210 : vector<8x31xf32>
    %222 = arith.addf %204, %221 : vector<8x31xf32>
    %c23 = arith.constant 23 : index
    %223 = memref.load %arg3[%c23] : memref<96xf32, #tpu.memory_space<smem>>
    %224 = vector.broadcast %223 : f32 to vector<8x31xf32>
    %225 = arith.mulf %224, %210 : vector<8x31xf32>
    %226 = arith.addf %208, %225 : vector<8x31xf32>
    %c1_88 = arith.constant 1 : index
    %c0_89 = arith.constant 0 : index
    %c0_90 = arith.constant 0 : index
    %227 = vector.load %arg6[%c1_88, %c0_89, %c0_90] : memref<4x9x33xf32, #tpu.memory_space<vmem>>, vector<1x8x31xf32>
    %228 = vector.shape_cast %227 : vector<1x8x31xf32> to vector<8x31xf32>
    %c24 = arith.constant 24 : index
    %229 = memref.load %arg3[%c24] : memref<96xf32, #tpu.memory_space<smem>>
    %230 = vector.broadcast %229 : f32 to vector<8x31xf32>
    %231 = arith.mulf %230, %228 : vector<8x31xf32>
    %232 = arith.addf %214, %231 : vector<8x31xf32>
    %c25 = arith.constant 25 : index
    %233 = memref.load %arg3[%c25] : memref<96xf32, #tpu.memory_space<smem>>
    %234 = vector.broadcast %233 : f32 to vector<8x31xf32>
    %235 = arith.mulf %234, %228 : vector<8x31xf32>
    %236 = arith.addf %218, %235 : vector<8x31xf32>
    %c26 = arith.constant 26 : index
    %237 = memref.load %arg3[%c26] : memref<96xf32, #tpu.memory_space<smem>>
    %238 = vector.broadcast %237 : f32 to vector<8x31xf32>
    %239 = arith.mulf %238, %228 : vector<8x31xf32>
    %240 = arith.addf %222, %239 : vector<8x31xf32>
    %c27 = arith.constant 27 : index
    %241 = memref.load %arg3[%c27] : memref<96xf32, #tpu.memory_space<smem>>
    %242 = vector.broadcast %241 : f32 to vector<8x31xf32>
    %243 = arith.mulf %242, %228 : vector<8x31xf32>
    %244 = arith.addf %226, %243 : vector<8x31xf32>
    %c1_91 = arith.constant 1 : index
    %c0_92 = arith.constant 0 : index
    %c1_93 = arith.constant 1 : index
    %245 = vector.load %arg6[%c1_91, %c0_92, %c1_93] : memref<4x9x33xf32, #tpu.memory_space<vmem>>, vector<1x8x31xf32>
    %246 = vector.shape_cast %245 : vector<1x8x31xf32> to vector<8x31xf32>
    %c28 = arith.constant 28 : index
    %247 = memref.load %arg3[%c28] : memref<96xf32, #tpu.memory_space<smem>>
    %248 = vector.broadcast %247 : f32 to vector<8x31xf32>
    %249 = arith.mulf %248, %246 : vector<8x31xf32>
    %250 = arith.addf %232, %249 : vector<8x31xf32>
    %c29 = arith.constant 29 : index
    %251 = memref.load %arg3[%c29] : memref<96xf32, #tpu.memory_space<smem>>
    %252 = vector.broadcast %251 : f32 to vector<8x31xf32>
    %253 = arith.mulf %252, %246 : vector<8x31xf32>
    %254 = arith.addf %236, %253 : vector<8x31xf32>
    %c30 = arith.constant 30 : index
    %255 = memref.load %arg3[%c30] : memref<96xf32, #tpu.memory_space<smem>>
    %256 = vector.broadcast %255 : f32 to vector<8x31xf32>
    %257 = arith.mulf %256, %246 : vector<8x31xf32>
    %258 = arith.addf %240, %257 : vector<8x31xf32>
    %c31 = arith.constant 31 : index
    %259 = memref.load %arg3[%c31] : memref<96xf32, #tpu.memory_space<smem>>
    %260 = vector.broadcast %259 : f32 to vector<8x31xf32>
    %261 = arith.mulf %260, %246 : vector<8x31xf32>
    %262 = arith.addf %244, %261 : vector<8x31xf32>
    %c1_94 = arith.constant 1 : index
    %c0_95 = arith.constant 0 : index
    %c2_96 = arith.constant 2 : index
    %263 = vector.load %arg6[%c1_94, %c0_95, %c2_96] : memref<4x9x33xf32, #tpu.memory_space<vmem>>, vector<1x8x31xf32>
    %264 = vector.shape_cast %263 : vector<1x8x31xf32> to vector<8x31xf32>
    %c32 = arith.constant 32 : index
    %265 = memref.load %arg3[%c32] : memref<96xf32, #tpu.memory_space<smem>>
    %266 = vector.broadcast %265 : f32 to vector<8x31xf32>
    %267 = arith.mulf %266, %264 : vector<8x31xf32>
    %268 = arith.addf %250, %267 : vector<8x31xf32>
    %c33 = arith.constant 33 : index
    %269 = memref.load %arg3[%c33] : memref<96xf32, #tpu.memory_space<smem>>
    %270 = vector.broadcast %269 : f32 to vector<8x31xf32>
    %271 = arith.mulf %270, %264 : vector<8x31xf32>
    %272 = arith.addf %254, %271 : vector<8x31xf32>
    %c34 = arith.constant 34 : index
    %273 = memref.load %arg3[%c34] : memref<96xf32, #tpu.memory_space<smem>>
    %274 = vector.broadcast %273 : f32 to vector<8x31xf32>
    %275 = arith.mulf %274, %264 : vector<8x31xf32>
    %276 = arith.addf %258, %275 : vector<8x31xf32>
    %c35 = arith.constant 35 : index
    %277 = memref.load %arg3[%c35] : memref<96xf32, #tpu.memory_space<smem>>
    %278 = vector.broadcast %277 : f32 to vector<8x31xf32>
    %279 = arith.mulf %278, %264 : vector<8x31xf32>
    %280 = arith.addf %262, %279 : vector<8x31xf32>
    %c1_97 = arith.constant 1 : index
    %c1_98 = arith.constant 1 : index
    %c0_99 = arith.constant 0 : index
    %281 = vector.load %arg6[%c1_97, %c1_98, %c0_99] : memref<4x9x33xf32, #tpu.memory_space<vmem>>, vector<1x8x31xf32>
    %282 = vector.shape_cast %281 : vector<1x8x31xf32> to vector<8x31xf32>
    %c36 = arith.constant 36 : index
    %283 = memref.load %arg3[%c36] : memref<96xf32, #tpu.memory_space<smem>>
    %284 = vector.broadcast %283 : f32 to vector<8x31xf32>
    %285 = arith.mulf %284, %282 : vector<8x31xf32>
    %286 = arith.addf %268, %285 : vector<8x31xf32>
    %c37 = arith.constant 37 : index
    %287 = memref.load %arg3[%c37] : memref<96xf32, #tpu.memory_space<smem>>
    %288 = vector.broadcast %287 : f32 to vector<8x31xf32>
    %289 = arith.mulf %288, %282 : vector<8x31xf32>
    %290 = arith.addf %272, %289 : vector<8x31xf32>
    %c38 = arith.constant 38 : index
    %291 = memref.load %arg3[%c38] : memref<96xf32, #tpu.memory_space<smem>>
    %292 = vector.broadcast %291 : f32 to vector<8x31xf32>
    %293 = arith.mulf %292, %282 : vector<8x31xf32>
    %294 = arith.addf %276, %293 : vector<8x31xf32>
    %c39 = arith.constant 39 : index
    %295 = memref.load %arg3[%c39] : memref<96xf32, #tpu.memory_space<smem>>
    %296 = vector.broadcast %295 : f32 to vector<8x31xf32>
    %297 = arith.mulf %296, %282 : vector<8x31xf32>
    %298 = arith.addf %280, %297 : vector<8x31xf32>
    %c1_100 = arith.constant 1 : index
    %c1_101 = arith.constant 1 : index
    %c1_102 = arith.constant 1 : index
    %299 = vector.load %arg6[%c1_100, %c1_101, %c1_102] : memref<4x9x33xf32, #tpu.memory_space<vmem>>, vector<1x8x31xf32>
    %300 = vector.shape_cast %299 : vector<1x8x31xf32> to vector<8x31xf32>
    %c40 = arith.constant 40 : index
    %301 = memref.load %arg3[%c40] : memref<96xf32, #tpu.memory_space<smem>>
    %302 = vector.broadcast %301 : f32 to vector<8x31xf32>
    %303 = arith.mulf %302, %300 : vector<8x31xf32>
    %304 = arith.addf %286, %303 : vector<8x31xf32>
    %c41 = arith.constant 41 : index
    %305 = memref.load %arg3[%c41] : memref<96xf32, #tpu.memory_space<smem>>
    %306 = vector.broadcast %305 : f32 to vector<8x31xf32>
    %307 = arith.mulf %306, %300 : vector<8x31xf32>
    %308 = arith.addf %290, %307 : vector<8x31xf32>
    %c42 = arith.constant 42 : index
    %309 = memref.load %arg3[%c42] : memref<96xf32, #tpu.memory_space<smem>>
    %310 = vector.broadcast %309 : f32 to vector<8x31xf32>
    %311 = arith.mulf %310, %300 : vector<8x31xf32>
    %312 = arith.addf %294, %311 : vector<8x31xf32>
    %c43 = arith.constant 43 : index
    %313 = memref.load %arg3[%c43] : memref<96xf32, #tpu.memory_space<smem>>
    %314 = vector.broadcast %313 : f32 to vector<8x31xf32>
    %315 = arith.mulf %314, %300 : vector<8x31xf32>
    %316 = arith.addf %298, %315 : vector<8x31xf32>
    %c1_103 = arith.constant 1 : index
    %c1_104 = arith.constant 1 : index
    %c2_105 = arith.constant 2 : index
    %317 = vector.load %arg6[%c1_103, %c1_104, %c2_105] : memref<4x9x33xf32, #tpu.memory_space<vmem>>, vector<1x8x31xf32>
    %318 = vector.shape_cast %317 : vector<1x8x31xf32> to vector<8x31xf32>
    %c44 = arith.constant 44 : index
    %319 = memref.load %arg3[%c44] : memref<96xf32, #tpu.memory_space<smem>>
    %320 = vector.broadcast %319 : f32 to vector<8x31xf32>
    %321 = arith.mulf %320, %318 : vector<8x31xf32>
    %322 = arith.addf %304, %321 : vector<8x31xf32>
    %c45 = arith.constant 45 : index
    %323 = memref.load %arg3[%c45] : memref<96xf32, #tpu.memory_space<smem>>
    %324 = vector.broadcast %323 : f32 to vector<8x31xf32>
    %325 = arith.mulf %324, %318 : vector<8x31xf32>
    %326 = arith.addf %308, %325 : vector<8x31xf32>
    %c46 = arith.constant 46 : index
    %327 = memref.load %arg3[%c46] : memref<96xf32, #tpu.memory_space<smem>>
    %328 = vector.broadcast %327 : f32 to vector<8x31xf32>
    %329 = arith.mulf %328, %318 : vector<8x31xf32>
    %330 = arith.addf %312, %329 : vector<8x31xf32>
    %c47 = arith.constant 47 : index
    %331 = memref.load %arg3[%c47] : memref<96xf32, #tpu.memory_space<smem>>
    %332 = vector.broadcast %331 : f32 to vector<8x31xf32>
    %333 = arith.mulf %332, %318 : vector<8x31xf32>
    %334 = arith.addf %316, %333 : vector<8x31xf32>
    %c2_106 = arith.constant 2 : index
    %c0_107 = arith.constant 0 : index
    %c0_108 = arith.constant 0 : index
    %335 = vector.load %arg6[%c2_106, %c0_107, %c0_108] : memref<4x9x33xf32, #tpu.memory_space<vmem>>, vector<1x8x31xf32>
    %336 = vector.shape_cast %335 : vector<1x8x31xf32> to vector<8x31xf32>
    %c48 = arith.constant 48 : index
    %337 = memref.load %arg3[%c48] : memref<96xf32, #tpu.memory_space<smem>>
    %338 = vector.broadcast %337 : f32 to vector<8x31xf32>
    %339 = arith.mulf %338, %336 : vector<8x31xf32>
    %340 = arith.addf %322, %339 : vector<8x31xf32>
    %c49 = arith.constant 49 : index
    %341 = memref.load %arg3[%c49] : memref<96xf32, #tpu.memory_space<smem>>
    %342 = vector.broadcast %341 : f32 to vector<8x31xf32>
    %343 = arith.mulf %342, %336 : vector<8x31xf32>
    %344 = arith.addf %326, %343 : vector<8x31xf32>
    %c50 = arith.constant 50 : index
    %345 = memref.load %arg3[%c50] : memref<96xf32, #tpu.memory_space<smem>>
    %346 = vector.broadcast %345 : f32 to vector<8x31xf32>
    %347 = arith.mulf %346, %336 : vector<8x31xf32>
    %348 = arith.addf %330, %347 : vector<8x31xf32>
    %c51 = arith.constant 51 : index
    %349 = memref.load %arg3[%c51] : memref<96xf32, #tpu.memory_space<smem>>
    %350 = vector.broadcast %349 : f32 to vector<8x31xf32>
    %351 = arith.mulf %350, %336 : vector<8x31xf32>
    %352 = arith.addf %334, %351 : vector<8x31xf32>
    %c2_109 = arith.constant 2 : index
    %c0_110 = arith.constant 0 : index
    %c1_111 = arith.constant 1 : index
    %353 = vector.load %arg6[%c2_109, %c0_110, %c1_111] : memref<4x9x33xf32, #tpu.memory_space<vmem>>, vector<1x8x31xf32>
    %354 = vector.shape_cast %353 : vector<1x8x31xf32> to vector<8x31xf32>
    %c52 = arith.constant 52 : index
    %355 = memref.load %arg3[%c52] : memref<96xf32, #tpu.memory_space<smem>>
    %356 = vector.broadcast %355 : f32 to vector<8x31xf32>
    %357 = arith.mulf %356, %354 : vector<8x31xf32>
    %358 = arith.addf %340, %357 : vector<8x31xf32>
    %c53 = arith.constant 53 : index
    %359 = memref.load %arg3[%c53] : memref<96xf32, #tpu.memory_space<smem>>
    %360 = vector.broadcast %359 : f32 to vector<8x31xf32>
    %361 = arith.mulf %360, %354 : vector<8x31xf32>
    %362 = arith.addf %344, %361 : vector<8x31xf32>
    %c54 = arith.constant 54 : index
    %363 = memref.load %arg3[%c54] : memref<96xf32, #tpu.memory_space<smem>>
    %364 = vector.broadcast %363 : f32 to vector<8x31xf32>
    %365 = arith.mulf %364, %354 : vector<8x31xf32>
    %366 = arith.addf %348, %365 : vector<8x31xf32>
    %c55 = arith.constant 55 : index
    %367 = memref.load %arg3[%c55] : memref<96xf32, #tpu.memory_space<smem>>
    %368 = vector.broadcast %367 : f32 to vector<8x31xf32>
    %369 = arith.mulf %368, %354 : vector<8x31xf32>
    %370 = arith.addf %352, %369 : vector<8x31xf32>
    %c2_112 = arith.constant 2 : index
    %c0_113 = arith.constant 0 : index
    %c2_114 = arith.constant 2 : index
    %371 = vector.load %arg6[%c2_112, %c0_113, %c2_114] : memref<4x9x33xf32, #tpu.memory_space<vmem>>, vector<1x8x31xf32>
    %372 = vector.shape_cast %371 : vector<1x8x31xf32> to vector<8x31xf32>
    %c56 = arith.constant 56 : index
    %373 = memref.load %arg3[%c56] : memref<96xf32, #tpu.memory_space<smem>>
    %374 = vector.broadcast %373 : f32 to vector<8x31xf32>
    %375 = arith.mulf %374, %372 : vector<8x31xf32>
    %376 = arith.addf %358, %375 : vector<8x31xf32>
    %c57 = arith.constant 57 : index
    %377 = memref.load %arg3[%c57] : memref<96xf32, #tpu.memory_space<smem>>
    %378 = vector.broadcast %377 : f32 to vector<8x31xf32>
    %379 = arith.mulf %378, %372 : vector<8x31xf32>
    %380 = arith.addf %362, %379 : vector<8x31xf32>
    %c58 = arith.constant 58 : index
    %381 = memref.load %arg3[%c58] : memref<96xf32, #tpu.memory_space<smem>>
    %382 = vector.broadcast %381 : f32 to vector<8x31xf32>
    %383 = arith.mulf %382, %372 : vector<8x31xf32>
    %384 = arith.addf %366, %383 : vector<8x31xf32>
    %c59 = arith.constant 59 : index
    %385 = memref.load %arg3[%c59] : memref<96xf32, #tpu.memory_space<smem>>
    %386 = vector.broadcast %385 : f32 to vector<8x31xf32>
    %387 = arith.mulf %386, %372 : vector<8x31xf32>
    %388 = arith.addf %370, %387 : vector<8x31xf32>
    %c2_115 = arith.constant 2 : index
    %c1_116 = arith.constant 1 : index
    %c0_117 = arith.constant 0 : index
    %389 = vector.load %arg6[%c2_115, %c1_116, %c0_117] : memref<4x9x33xf32, #tpu.memory_space<vmem>>, vector<1x8x31xf32>
    %390 = vector.shape_cast %389 : vector<1x8x31xf32> to vector<8x31xf32>
    %c60 = arith.constant 60 : index
    %391 = memref.load %arg3[%c60] : memref<96xf32, #tpu.memory_space<smem>>
    %392 = vector.broadcast %391 : f32 to vector<8x31xf32>
    %393 = arith.mulf %392, %390 : vector<8x31xf32>
    %394 = arith.addf %376, %393 : vector<8x31xf32>
    %c61 = arith.constant 61 : index
    %395 = memref.load %arg3[%c61] : memref<96xf32, #tpu.memory_space<smem>>
    %396 = vector.broadcast %395 : f32 to vector<8x31xf32>
    %397 = arith.mulf %396, %390 : vector<8x31xf32>
    %398 = arith.addf %380, %397 : vector<8x31xf32>
    %c62 = arith.constant 62 : index
    %399 = memref.load %arg3[%c62] : memref<96xf32, #tpu.memory_space<smem>>
    %400 = vector.broadcast %399 : f32 to vector<8x31xf32>
    %401 = arith.mulf %400, %390 : vector<8x31xf32>
    %402 = arith.addf %384, %401 : vector<8x31xf32>
    %c63 = arith.constant 63 : index
    %403 = memref.load %arg3[%c63] : memref<96xf32, #tpu.memory_space<smem>>
    %404 = vector.broadcast %403 : f32 to vector<8x31xf32>
    %405 = arith.mulf %404, %390 : vector<8x31xf32>
    %406 = arith.addf %388, %405 : vector<8x31xf32>
    %c2_118 = arith.constant 2 : index
    %c1_119 = arith.constant 1 : index
    %c1_120 = arith.constant 1 : index
    %407 = vector.load %arg6[%c2_118, %c1_119, %c1_120] : memref<4x9x33xf32, #tpu.memory_space<vmem>>, vector<1x8x31xf32>
    %408 = vector.shape_cast %407 : vector<1x8x31xf32> to vector<8x31xf32>
    %c64 = arith.constant 64 : index
    %409 = memref.load %arg3[%c64] : memref<96xf32, #tpu.memory_space<smem>>
    %410 = vector.broadcast %409 : f32 to vector<8x31xf32>
    %411 = arith.mulf %410, %408 : vector<8x31xf32>
    %412 = arith.addf %394, %411 : vector<8x31xf32>
    %c65 = arith.constant 65 : index
    %413 = memref.load %arg3[%c65] : memref<96xf32, #tpu.memory_space<smem>>
    %414 = vector.broadcast %413 : f32 to vector<8x31xf32>
    %415 = arith.mulf %414, %408 : vector<8x31xf32>
    %416 = arith.addf %398, %415 : vector<8x31xf32>
    %c66 = arith.constant 66 : index
    %417 = memref.load %arg3[%c66] : memref<96xf32, #tpu.memory_space<smem>>
    %418 = vector.broadcast %417 : f32 to vector<8x31xf32>
    %419 = arith.mulf %418, %408 : vector<8x31xf32>
    %420 = arith.addf %402, %419 : vector<8x31xf32>
    %c67 = arith.constant 67 : index
    %421 = memref.load %arg3[%c67] : memref<96xf32, #tpu.memory_space<smem>>
    %422 = vector.broadcast %421 : f32 to vector<8x31xf32>
    %423 = arith.mulf %422, %408 : vector<8x31xf32>
    %424 = arith.addf %406, %423 : vector<8x31xf32>
    %c2_121 = arith.constant 2 : index
    %c1_122 = arith.constant 1 : index
    %c2_123 = arith.constant 2 : index
    %425 = vector.load %arg6[%c2_121, %c1_122, %c2_123] : memref<4x9x33xf32, #tpu.memory_space<vmem>>, vector<1x8x31xf32>
    %426 = vector.shape_cast %425 : vector<1x8x31xf32> to vector<8x31xf32>
    %c68 = arith.constant 68 : index
    %427 = memref.load %arg3[%c68] : memref<96xf32, #tpu.memory_space<smem>>
    %428 = vector.broadcast %427 : f32 to vector<8x31xf32>
    %429 = arith.mulf %428, %426 : vector<8x31xf32>
    %430 = arith.addf %412, %429 : vector<8x31xf32>
    %c69 = arith.constant 69 : index
    %431 = memref.load %arg3[%c69] : memref<96xf32, #tpu.memory_space<smem>>
    %432 = vector.broadcast %431 : f32 to vector<8x31xf32>
    %433 = arith.mulf %432, %426 : vector<8x31xf32>
    %434 = arith.addf %416, %433 : vector<8x31xf32>
    %c70 = arith.constant 70 : index
    %435 = memref.load %arg3[%c70] : memref<96xf32, #tpu.memory_space<smem>>
    %436 = vector.broadcast %435 : f32 to vector<8x31xf32>
    %437 = arith.mulf %436, %426 : vector<8x31xf32>
    %438 = arith.addf %420, %437 : vector<8x31xf32>
    %c71 = arith.constant 71 : index
    %439 = memref.load %arg3[%c71] : memref<96xf32, #tpu.memory_space<smem>>
    %440 = vector.broadcast %439 : f32 to vector<8x31xf32>
    %441 = arith.mulf %440, %426 : vector<8x31xf32>
    %442 = arith.addf %424, %441 : vector<8x31xf32>
    %c3_124 = arith.constant 3 : index
    %c0_125 = arith.constant 0 : index
    %c0_126 = arith.constant 0 : index
    %443 = vector.load %arg6[%c3_124, %c0_125, %c0_126] : memref<4x9x33xf32, #tpu.memory_space<vmem>>, vector<1x8x31xf32>
    %444 = vector.shape_cast %443 : vector<1x8x31xf32> to vector<8x31xf32>
    %c72 = arith.constant 72 : index
    %445 = memref.load %arg3[%c72] : memref<96xf32, #tpu.memory_space<smem>>
    %446 = vector.broadcast %445 : f32 to vector<8x31xf32>
    %447 = arith.mulf %446, %444 : vector<8x31xf32>
    %448 = arith.addf %430, %447 : vector<8x31xf32>
    %c73 = arith.constant 73 : index
    %449 = memref.load %arg3[%c73] : memref<96xf32, #tpu.memory_space<smem>>
    %450 = vector.broadcast %449 : f32 to vector<8x31xf32>
    %451 = arith.mulf %450, %444 : vector<8x31xf32>
    %452 = arith.addf %434, %451 : vector<8x31xf32>
    %c74 = arith.constant 74 : index
    %453 = memref.load %arg3[%c74] : memref<96xf32, #tpu.memory_space<smem>>
    %454 = vector.broadcast %453 : f32 to vector<8x31xf32>
    %455 = arith.mulf %454, %444 : vector<8x31xf32>
    %456 = arith.addf %438, %455 : vector<8x31xf32>
    %c75 = arith.constant 75 : index
    %457 = memref.load %arg3[%c75] : memref<96xf32, #tpu.memory_space<smem>>
    %458 = vector.broadcast %457 : f32 to vector<8x31xf32>
    %459 = arith.mulf %458, %444 : vector<8x31xf32>
    %460 = arith.addf %442, %459 : vector<8x31xf32>
    %c3_127 = arith.constant 3 : index
    %c0_128 = arith.constant 0 : index
    %c1_129 = arith.constant 1 : index
    %461 = vector.load %arg6[%c3_127, %c0_128, %c1_129] : memref<4x9x33xf32, #tpu.memory_space<vmem>>, vector<1x8x31xf32>
    %462 = vector.shape_cast %461 : vector<1x8x31xf32> to vector<8x31xf32>
    %c76 = arith.constant 76 : index
    %463 = memref.load %arg3[%c76] : memref<96xf32, #tpu.memory_space<smem>>
    %464 = vector.broadcast %463 : f32 to vector<8x31xf32>
    %465 = arith.mulf %464, %462 : vector<8x31xf32>
    %466 = arith.addf %448, %465 : vector<8x31xf32>
    %c77 = arith.constant 77 : index
    %467 = memref.load %arg3[%c77] : memref<96xf32, #tpu.memory_space<smem>>
    %468 = vector.broadcast %467 : f32 to vector<8x31xf32>
    %469 = arith.mulf %468, %462 : vector<8x31xf32>
    %470 = arith.addf %452, %469 : vector<8x31xf32>
    %c78 = arith.constant 78 : index
    %471 = memref.load %arg3[%c78] : memref<96xf32, #tpu.memory_space<smem>>
    %472 = vector.broadcast %471 : f32 to vector<8x31xf32>
    %473 = arith.mulf %472, %462 : vector<8x31xf32>
    %474 = arith.addf %456, %473 : vector<8x31xf32>
    %c79 = arith.constant 79 : index
    %475 = memref.load %arg3[%c79] : memref<96xf32, #tpu.memory_space<smem>>
    %476 = vector.broadcast %475 : f32 to vector<8x31xf32>
    %477 = arith.mulf %476, %462 : vector<8x31xf32>
    %478 = arith.addf %460, %477 : vector<8x31xf32>
    %c3_130 = arith.constant 3 : index
    %c0_131 = arith.constant 0 : index
    %c2_132 = arith.constant 2 : index
    %479 = vector.load %arg6[%c3_130, %c0_131, %c2_132] : memref<4x9x33xf32, #tpu.memory_space<vmem>>, vector<1x8x31xf32>
    %480 = vector.shape_cast %479 : vector<1x8x31xf32> to vector<8x31xf32>
    %c80 = arith.constant 80 : index
    %481 = memref.load %arg3[%c80] : memref<96xf32, #tpu.memory_space<smem>>
    %482 = vector.broadcast %481 : f32 to vector<8x31xf32>
    %483 = arith.mulf %482, %480 : vector<8x31xf32>
    %484 = arith.addf %466, %483 : vector<8x31xf32>
    %c81 = arith.constant 81 : index
    %485 = memref.load %arg3[%c81] : memref<96xf32, #tpu.memory_space<smem>>
    %486 = vector.broadcast %485 : f32 to vector<8x31xf32>
    %487 = arith.mulf %486, %480 : vector<8x31xf32>
    %488 = arith.addf %470, %487 : vector<8x31xf32>
    %c82 = arith.constant 82 : index
    %489 = memref.load %arg3[%c82] : memref<96xf32, #tpu.memory_space<smem>>
    %490 = vector.broadcast %489 : f32 to vector<8x31xf32>
    %491 = arith.mulf %490, %480 : vector<8x31xf32>
    %492 = arith.addf %474, %491 : vector<8x31xf32>
    %c83 = arith.constant 83 : index
    %493 = memref.load %arg3[%c83] : memref<96xf32, #tpu.memory_space<smem>>
    %494 = vector.broadcast %493 : f32 to vector<8x31xf32>
    %495 = arith.mulf %494, %480 : vector<8x31xf32>
    %496 = arith.addf %478, %495 : vector<8x31xf32>
    %c3_133 = arith.constant 3 : index
    %c1_134 = arith.constant 1 : index
    %c0_135 = arith.constant 0 : index
    %497 = vector.load %arg6[%c3_133, %c1_134, %c0_135] : memref<4x9x33xf32, #tpu.memory_space<vmem>>, vector<1x8x31xf32>
    %498 = vector.shape_cast %497 : vector<1x8x31xf32> to vector<8x31xf32>
    %c84 = arith.constant 84 : index
    %499 = memref.load %arg3[%c84] : memref<96xf32, #tpu.memory_space<smem>>
    %500 = vector.broadcast %499 : f32 to vector<8x31xf32>
    %501 = arith.mulf %500, %498 : vector<8x31xf32>
    %502 = arith.addf %484, %501 : vector<8x31xf32>
    %c85 = arith.constant 85 : index
    %503 = memref.load %arg3[%c85] : memref<96xf32, #tpu.memory_space<smem>>
    %504 = vector.broadcast %503 : f32 to vector<8x31xf32>
    %505 = arith.mulf %504, %498 : vector<8x31xf32>
    %506 = arith.addf %488, %505 : vector<8x31xf32>
    %c86 = arith.constant 86 : index
    %507 = memref.load %arg3[%c86] : memref<96xf32, #tpu.memory_space<smem>>
    %508 = vector.broadcast %507 : f32 to vector<8x31xf32>
    %509 = arith.mulf %508, %498 : vector<8x31xf32>
    %510 = arith.addf %492, %509 : vector<8x31xf32>
    %c87 = arith.constant 87 : index
    %511 = memref.load %arg3[%c87] : memref<96xf32, #tpu.memory_space<smem>>
    %512 = vector.broadcast %511 : f32 to vector<8x31xf32>
    %513 = arith.mulf %512, %498 : vector<8x31xf32>
    %514 = arith.addf %496, %513 : vector<8x31xf32>
    %c3_136 = arith.constant 3 : index
    %c1_137 = arith.constant 1 : index
    %c1_138 = arith.constant 1 : index
    %515 = vector.load %arg6[%c3_136, %c1_137, %c1_138] : memref<4x9x33xf32, #tpu.memory_space<vmem>>, vector<1x8x31xf32>
    %516 = vector.shape_cast %515 : vector<1x8x31xf32> to vector<8x31xf32>
    %c88 = arith.constant 88 : index
    %517 = memref.load %arg3[%c88] : memref<96xf32, #tpu.memory_space<smem>>
    %518 = vector.broadcast %517 : f32 to vector<8x31xf32>
    %519 = arith.mulf %518, %516 : vector<8x31xf32>
    %520 = arith.addf %502, %519 : vector<8x31xf32>
    %c89 = arith.constant 89 : index
    %521 = memref.load %arg3[%c89] : memref<96xf32, #tpu.memory_space<smem>>
    %522 = vector.broadcast %521 : f32 to vector<8x31xf32>
    %523 = arith.mulf %522, %516 : vector<8x31xf32>
    %524 = arith.addf %506, %523 : vector<8x31xf32>
    %c90 = arith.constant 90 : index
    %525 = memref.load %arg3[%c90] : memref<96xf32, #tpu.memory_space<smem>>
    %526 = vector.broadcast %525 : f32 to vector<8x31xf32>
    %527 = arith.mulf %526, %516 : vector<8x31xf32>
    %528 = arith.addf %510, %527 : vector<8x31xf32>
    %c91 = arith.constant 91 : index
    %529 = memref.load %arg3[%c91] : memref<96xf32, #tpu.memory_space<smem>>
    %530 = vector.broadcast %529 : f32 to vector<8x31xf32>
    %531 = arith.mulf %530, %516 : vector<8x31xf32>
    %532 = arith.addf %514, %531 : vector<8x31xf32>
    %c3_139 = arith.constant 3 : index
    %c1_140 = arith.constant 1 : index
    %c2_141 = arith.constant 2 : index
    %533 = vector.load %arg6[%c3_139, %c1_140, %c2_141] : memref<4x9x33xf32, #tpu.memory_space<vmem>>, vector<1x8x31xf32>
    %534 = vector.shape_cast %533 : vector<1x8x31xf32> to vector<8x31xf32>
    %c92 = arith.constant 92 : index
    %535 = memref.load %arg3[%c92] : memref<96xf32, #tpu.memory_space<smem>>
    %536 = vector.broadcast %535 : f32 to vector<8x31xf32>
    %537 = arith.mulf %536, %534 : vector<8x31xf32>
    %538 = arith.addf %520, %537 : vector<8x31xf32>
    %c93 = arith.constant 93 : index
    %539 = memref.load %arg3[%c93] : memref<96xf32, #tpu.memory_space<smem>>
    %540 = vector.broadcast %539 : f32 to vector<8x31xf32>
    %541 = arith.mulf %540, %534 : vector<8x31xf32>
    %542 = arith.addf %524, %541 : vector<8x31xf32>
    %c94 = arith.constant 94 : index
    %543 = memref.load %arg3[%c94] : memref<96xf32, #tpu.memory_space<smem>>
    %544 = vector.broadcast %543 : f32 to vector<8x31xf32>
    %545 = arith.mulf %544, %534 : vector<8x31xf32>
    %546 = arith.addf %528, %545 : vector<8x31xf32>
    %c95 = arith.constant 95 : index
    %547 = memref.load %arg3[%c95] : memref<96xf32, #tpu.memory_space<smem>>
    %548 = vector.broadcast %547 : f32 to vector<8x31xf32>
    %549 = arith.mulf %548, %534 : vector<8x31xf32>
    %550 = arith.addf %532, %549 : vector<8x31xf32>
    %c0_142 = arith.constant 0 : index
    %c0_143 = arith.constant 0 : index
    %c0_144 = arith.constant 0 : index
    %c0_145 = arith.constant 0 : index
    %551 = vector.load %arg5[%c0_142, %c0_143, %c0_144, %c0_145] : memref<1x4x8x31xf32, #tpu.memory_space<vmem>>, vector<1x1x8x31xf32>
    %552 = vector.shape_cast %551 : vector<1x1x8x31xf32> to vector<8x31xf32>
    %553 = vector.shape_cast %538 : vector<8x31xf32> to vector<1x1x8x31xf32>
    tpu.vector_store %arg5[%c0_142, %c0_143, %c0_144, %c0_145], %553 {strides = array<i32>} : memref<1x4x8x31xf32, #tpu.memory_space<vmem>>, vector<1x1x8x31xf32>,
    %c0_146 = arith.constant 0 : index
    %c1_147 = arith.constant 1 : index
    %c0_148 = arith.constant 0 : index
    %c0_149 = arith.constant 0 : index
    %554 = vector.load %arg5[%c0_146, %c1_147, %c0_148, %c0_149] : memref<1x4x8x31xf32, #tpu.memory_space<vmem>>, vector<1x1x8x31xf32>
    %555 = vector.shape_cast %554 : vector<1x1x8x31xf32> to vector<8x31xf32>
    %556 = vector.shape_cast %542 : vector<8x31xf32> to vector<1x1x8x31xf32>
    tpu.vector_store %arg5[%c0_146, %c1_147, %c0_148, %c0_149], %556 {strides = array<i32>} : memref<1x4x8x31xf32, #tpu.memory_space<vmem>>, vector<1x1x8x31xf32>,
    %c0_150 = arith.constant 0 : index
    %c2_151 = arith.constant 2 : index
    %c0_152 = arith.constant 0 : index
    %c0_153 = arith.constant 0 : index
    %557 = vector.load %arg5[%c0_150, %c2_151, %c0_152, %c0_153] : memref<1x4x8x31xf32, #tpu.memory_space<vmem>>, vector<1x1x8x31xf32>
    %558 = vector.shape_cast %557 : vector<1x1x8x31xf32> to vector<8x31xf32>
    %559 = vector.shape_cast %546 : vector<8x31xf32> to vector<1x1x8x31xf32>
    tpu.vector_store %arg5[%c0_150, %c2_151, %c0_152, %c0_153], %559 {strides = array<i32>} : memref<1x4x8x31xf32, #tpu.memory_space<vmem>>, vector<1x1x8x31xf32>,
    %c0_154 = arith.constant 0 : index
    %c3_155 = arith.constant 3 : index
    %c0_156 = arith.constant 0 : index
    %c0_157 = arith.constant 0 : index
    %560 = vector.load %arg5[%c0_154, %c3_155, %c0_156, %c0_157] : memref<1x4x8x31xf32, #tpu.memory_space<vmem>>, vector<1x1x8x31xf32>
    %561 = vector.shape_cast %560 : vector<1x1x8x31xf32> to vector<8x31xf32>
    %562 = vector.shape_cast %550 : vector<8x31xf32> to vector<1x1x8x31xf32>
    tpu.vector_store %arg5[%c0_154, %c3_155, %c0_156, %c0_157], %562 {strides = array<i32>} : memref<1x4x8x31xf32, #tpu.memory_space<vmem>>, vector<1x1x8x31xf32>,
    return
  }
  func.func @transform_0(%arg0: i32, %arg1: i32) -> (i32, i32, i32, i32) {
    %c0_i32 = arith.constant 0 : i32
    %c0_i32_0 = arith.constant 0 : i32
    %c0_i32_1 = arith.constant 0 : i32
    %c0_i32_2 = arith.constant 0 : i32
    return %arg0, %c0_i32, %c0_i32_0, %c0_i32_1 : i32, i32, i32, i32
  }
  func.func @transform_1(%arg0: i32, %arg1: i32) -> i32 {
    %c0_i32 = arith.constant 0 : i32
    %c0_i32_0 = arith.constant 0 : i32
    return %c0_i32 : i32
  }
  func.func @transform_2(%arg0: i32, %arg1: i32) -> i32 {
    %c0_i32 = arith.constant 0 : i32
    %c0_i32_0 = arith.constant 0 : i32
    return %c0_i32 : i32
  }
  func.func @transform_3(%arg0: i32, %arg1: i32) -> (i32, i32, i32, i32) {
    %c0_i32 = arith.constant 0 : i32
    %c0_i32_0 = arith.constant 0 : i32
    %c0_i32_1 = arith.constant 0 : i32
    return %arg0, %c0_i32, %arg1, %c0_i32_0 : i32, i32, i32, i32
  }
}

</mosaic_0001>

<bundles_post_ra>
// kernel: _dilat_deconv2d_fwd.1
= control target key start
LH: loop header
LB: loop body
LE: loop exit
PB: predicated region body
PF: predicated region fallthrough
CT: control target
= control target key end

     0   :  { %8 = vsyncpa [#allocation4], 0  ;;  %s3581_s0 = inlined_call_operand.hbm [shape: f32[2,4,8,16], index: 0, kind: input, shape index: {}]   ;;  %s3582_s1 = inlined_call_operand.vmem [shape: f32[96], index: 1, kind: input, shape index: {}]   ;;  %s3583_s2 = inlined_call_operand.vmem [shape: f32[4], index: 2, kind: input, shape index: {}]   ;;  %s3584_s3 = inlined_call_operand.hbm [shape: f32[2,4,8,31], index: 3, kind: output, shape index: {}]  }
   0x1   :  { %10 = vsyncpa [#allocation4 + $0x1], 0 }
   0x2   :  { %11 = vsyncpa [#allocation6], 0 }
   0x3   :  { %12 = vsyncpa [#allocation9], 0 }
   0x4   :  { %13 = vsyncpa [#allocation5], 0 }
   0x5   :  { %15 = vsyncpa [#allocation5 + $0x1], 0  ;;  %s2968_s12 = smov 0   ;;  %s2970_s13 = smov 0  }
   0x6   :  { %s2972_s14 = smov 0   ;;  %s2974_s15 = smov 0  }
   0x7   :  { %s2976_s16 = smov 0   ;;  %s2978_s17 = smov 0  }
   0x8 LB: > { %s2287_s18 = sadd.s32 4294967295, %s2932_s17   ;;  %s2288_s19 = sadd.s32 4294967294, %s2932_s17   ;;  %s2932_s17 = sphi %s2978_s17, %s21_s17   ;;  %s2928_s16 = sphi %s2976_s16, %s3612_s16   ;;  %s2924_s15 = sphi %s2974_s15, %s3611_s15   ;;  %s2920_s14 = sphi %s2972_s14, %s3610_s14   ;;  %s2916_s13 = sphi %s2970_s13, %s3609_s13   ;;  %s2912_s12 = sphi %s2968_s12, %s3608_s12  }
   0x9   : > { %s40_s20 = sadd.s32 1, %s2920_s14  ;;  %p47_p0 = scmp.ne.s32.totalorder %s2920_s14, %s2916_s13 }
   0xa   : > { %p48_p1 = scmp.eq.s32.totalorder %s2932_s17, 0  ;;  %p53_p2 = scmp.ne.s32.totalorder %s2916_s13, %s2912_s12 }
   0xb   : > { %p3006_p3 = scmp.eq.s32.totalorder %s2287_s18, 0  ;;  %p121_p4 = scmp.eq.s32.totalorder %s2287_s18, 1 }
   0xc   : > { %p3010_p5 = por %p48_p1, %p47_p0  ;;  %p127_p6 = scmp.eq.s32.totalorder %s2288_s19, 1 }
   0xd   : > { %s3591_s21 = scalar_select %p3006_p3, 1, 0 }
   0xe   : > { %p3016_p7 = por %p3006_p3, %p53_p2  ;;  %p3020_p8 = por %p121_p4, %p47_p0 }
   0xf   : > { %p3024_p9 = por %p127_p6, %p53_p2  ;;  %p2289_p10 = scmp.ge.s32.totalorder %s2932_s17, 1 }
  0x10   : > { %s3593_s23 = scalar_select %p3016_p7, 1, 0 }
  0x11   : > { %s3594_s24 = scalar_select %p3020_p8, 1, 0 }
  0x12   : > { %s3595_s25 = scalar_select %p3024_p9, 1, 0 }
  0x13   : > { %p134_p11 = scmp.lt.s32.totalorder %s2932_s17, 3  ;;  %s147_s28 = sshll.u32 %s3582_s1, 4  ;;  %s148_s28 = int_to_ptr.vmem [resolvable:$true] %s147_s28 }
  0x14   : > { %p2718_p0 = scmp.lt.s32.totalorder %s2932_s17, 2  ;;  %s158_s5 = sshll.u32 %s3583_s2, 4  ;;  %s159_s5 = int_to_ptr.vmem [resolvable:$true] %s158_s5 }
  0x15   : > { %p3033_p12 = pnand %p2289_p10, %p134_p11  ;;  %s2782_s8 = scalar_lea.vmem %s148_s28, 16 }
  0x16   : > { %p3046_p2 = pnand %p2718_p0, %p3010_p5  ;;  %p2783_p6 = scmp.ne.s32.totalorder %s148_s28, %s2782_s8 }
  0x17   : > { %s3596_s29 = scalar_select %p3033_p12, 1, 0 }
  0x18   : > { %p2701_p1 = pneg %p3033_p12  ;;  %p2790_p9 = scmp.lt.s32.totalorder %s148_s28, %s148_s28 }
  0x19   : > { %s3597_s6 = scalar_select %p3046_p2, 1, 0 }
  0x1a   : > { %p3052_p4 = pnand %p2701_p1, %p3006_p3  ;;  %p2791_p8 = scmp.lt.s32.totalorder %s2782_s8, %s2782_s8 }
  0x1c   : > { %p2784_p10 = pneg %p3052_p4  ;;  %p2792_p7 = por %p2791_p8, %p2790_p9 }
  0x1e   : > { %p2785_p11 = pnand %p2784_p10, %p2783_p6 }
  0x20   : > { %p2786_p13 = pneg %p2785_p11 }
  0x22   : > { %p2793_p5 = pnand %p2792_p7, %p2786_p13 }
  0x24   : > { %2796 = shalt.err (!%p2793_p5)
}
  0x25   : > { %s2934_s9 = smov [#allocation7]   ;;  %s2797_s10 = scalar_lea.vmem %s159_s5, 16 }
  0x26   : > { %2704 = dma.vmem_to_smem (!%p3052_p4), %s148_s28, 16, %s2934_s9, [#allocation6]  }
  0x27   : > { %p2798_p0 = scmp.ne.s32.totalorder %s159_s5, %s2797_s10  ;;  %p2805_p12 = scmp.lt.s32.totalorder %s159_s5, %s159_s5 }
  0x28   : > { %p2806_p2 = scmp.lt.s32.totalorder %s2797_s10, %s2797_s10 }
  0x29   : > { %p2800_p1 = pnand %p2798_p0, %p2784_p10 }
  0x2a   : > { %p2807_p6 = por %p2806_p2, %p2805_p12 }
  0x2b   : > { %p2801_p3 = pneg %p2800_p1 }
  0x2d   : > { %p2808_p11 = pnand %p2807_p6, %p2801_p3 }
  0x2f   : > { %2811 = shalt.err (!%p2808_p11)
}
  0x30   : > { %s2935_s11 = smov [#allocation8]   ;;  %s33_s18 = sadd.s32 1, %s2928_s16 }
  0x31   : > { %2707 = dma.vmem_to_smem (!%p3052_p4), %s159_s5, 16, %s2935_s11, [#allocation9]  }
  0x32   : > { %s169_s19 = sand.u32 1, %s2920_s14   ;;  %p35_p7 = scmp.ge.s32.totalorder %s33_s18, 2 }
  0x33   : > { %s2293_s22 = sshll.u32 %s169_s19, 5  ;;  %s2463_s26 = sshll.u32 %s2928_s16, 9 }
  0x34   : > { %s3614_s18 = smov (%p35_p7, %s33_s18), 0  ;;  %s3070_s30 = scalar_lea.hbm %s3581_s0, %s2463_s26 }
  0x35   : > { %s37_s4 = ssub.s32 %s2928_s16, %s3614_s18  ;;  %s173_s5 = scalar_lea.vmem [#allocation3], %s2293_s22 }
  0x36   : > { %s180_s7 = sshll.u32 %s173_s5, 4  ;;  %p38_p3 = scmp.eq.s32.totalorder %s37_s4, 0  ;;  %s3074_s7 = int_to_ptr.vmem [resolvable:$true] %s180_s7 }
  0x37   : > { %s3081_s9 = scalar_lea.sflag [#allocation4], %s169_s19  ;;  %s2812_s10 = scalar_lea.hbm %s3070_s30, 512 }
  0x38   : > { %s3079_s8 = scalar_select %p38_p3, %s2920_s14, %s40_s20  }
  0x39   : > { %p2813_p8 = scmp.ne.s32.totalorder %s3070_s30, %s2812_s10  ;;  %p3599_p9 = scmp.ne.s32.totalorder %s3597_s6, 0 }
  0x3a   : > { %s2817_s22 = scalar_lea.hbm %s3581_s0, 1024  ;;  %p2818_p4 = scmp.lt.u32.totalorder %s3070_s30, %s3581_s0 }
  0x3b   : > { %p2814_p12 = pneg %p3599_p9  ;;  %p2819_p10 = scmp.lt.u32.totalorder %s2817_s22, %s2812_s10 }
  0x3c   : > { %p2821_p0 = scmp.lt.u32.totalorder %s2812_s10, %s3070_s30 }
  0x3d   : > { %p2815_p13 = pnand %p2814_p12, %p2813_p8  ;;  %p2820_p5 = por %p2819_p10, %p2818_p4 }
  0x3f   : > { %p2816_p2 = pneg %p2815_p13  ;;  %p2822_p1 = por %p2821_p0, %p2820_p5 }
  0x41   : > { %p2823_p6 = pnand %p2822_p1, %p2816_p2 }
  0x43   : > { %2826 = shalt.err (!%p2823_p6)
}
  0x44   : > { %s2827_s20 = scalar_lea.vmem %s3074_s7, 512  ;;  %s2936_s19 = smov [#allocation3]  }
  0x45   : > { %p2828_p11 = scmp.ne.s32.totalorder %s3074_s7, %s2827_s20  ;;  %s2832_s4 = sshll.u32 %s2936_s19, 4  ;;  %s2833_s4 = int_to_ptr.vmem [resolvable:$false] %s2832_s4 }
  0x46   : > { %s2834_s5 = scalar_lea.vmem %s2833_s4, 1024  ;;  %p2835_p8 = scmp.lt.s32.totalorder %s3074_s7, %s2833_s4 }
  0x47   : > { %p2830_p7 = pnand %p2828_p11, %p2814_p12  ;;  %p2836_p13 = scmp.lt.s32.totalorder %s2834_s5, %s2827_s20 }
  0x49   : > { %p2831_p3 = pneg %p2830_p7  ;;  %p2837_p4 = por %p2836_p13, %p2835_p8 }
  0x4b   : > { %p2838_p10 = pnand %p2837_p4, %p2831_p3 }
  0x4d   : > { %2841 = shalt.err (!%p2838_p10)
}
  0x4e   : > { %s2937_s10 = smov 128   ;;  %s2938_s11 = smov 8  }
  0x4f   : > { %2711 = dma.hbm_to_vmem [thread:$0]  (!%p3599_p9), %s3070_s30, 512, %s3074_s7, %s3081_s9, %s2937_s10, %s2937_s10, %s2938_s11  }
  0x50   : > { %p3600_p12 = scmp.ne.s32.totalorder %s3596_s29, 0 }
  0x51   : > { %s3112_s26 = sand.u32 (!%p3600_p12), 1, %s2916_s13   ;;  %p3601_p2 = scmp.ne.s32.totalorder (!%p3600_p12), %s3593_s23, 0 }
  0x52   : > { %192 = sbr.rel (%p3600_p12) target bundleno = 598 (0x256), region = 32  ;;  %s2297_s22 = sshll.u32 (!%p3600_p12), %s3112_s26, 5 }
  0x53   : > { %s195_s27 = scalar_lea.sflag (!%p3600_p12), [#allocation4], %s3112_s26  ;;  %s3118_s28 = scalar_lea.vmem (!%p3600_p12), [#allocation3], %s2297_s22 }
  0x59   : > { %2895 = dma.done.wait (%p3601_p2), %s195_s27, 512  }
  0x5a   : > { %2897 = vsyncadd (%p3601_p2), %s195_s27, 4294966784  ;;  %p3602_p9 = scmp.ne.s32.totalorder %s3591_s21, 0 }
  0x5c   : > { %2899 = dma.done.wait (%p3602_p9), [#allocation6], 16  }
  0x5d   : > { %2901 = vsyncadd (%p3602_p9), [#allocation6], 4294967280 }
  0x5e   : > { %2903 = dma.done.wait (%p3602_p9), [#allocation9], 16  }
  0x5f   : > { %2905 = vsyncadd (%p3602_p9), [#allocation9], 4294967280 }
  0x60   : > { %211 = sfence }
  0x61   : > { %v234_v0 = vlaneseq  ;;  %v250_v1 = vld [vmem:[%s3118_s28] sm:$0xff]  ;;  %v2939_v2 = vmov 0.0|0.0   ;;  %vm2940_vm0 = vmmov 0   ;;  %v2941_v5 = vmov 0.0   ;;  %v2315_v20 = vld [vmem:[%s3118_s28 + $0x8] sm:$0xff]  ;;  %v2329_v28 = vld [vmem:[%s3118_s28 + $0x10] sm:$0xff] }
  0x62   : > { %2625 = vmatprep.subr.bf16.mxu0 %v2939_v2  ;;  %2631 = vmatprep.subr.bf16.mxu1 %v2939_v2  ;;  %v404_v3 = vld [vmem:[%s3118_s28] sm:$0x1]  ;;  %v251_v6 = vpack.c.bf16 %v250_v1, %v250_v1  ;;  %v2942_v19 = vmov 1.0|1.0   ;;  %vm254_vm4 = vcmask 130048   ;;  %v559_v22 = vpack.c.bf16 %v2315_v20, %v2315_v20  ;;  %v2343_v36 = vld [vmem:[%s3118_s28 + $0x18] sm:$0xff] }
  0x63   : > { %v235_v4 = vshrl.u32 %v234_v0, 7  ;;  %2517 = vmatprep.mubr.msk.f32.mxu0 %vm2940_vm0, %v2941_v5  ;;  %2531 = vmatprep.mubr.msk.f32.mxu1 %vm2940_vm0, %v2941_v5  ;;  %v405_v7 = vpack.c.bf16 %v404_v3, %v404_v3  ;;  %v238_v9 = vand.u32 127, %v234_v0  ;;  %v2322_v21 = vld [vmem:[%s3118_s28 + $0x8] sm:$0x1]  ;;  %v2336_v29 = vld [vmem:[%s3118_s28 + $0x10] sm:$0x1]  ;;  %v866_v30 = vpack.c.bf16 %v2329_v28, %v2329_v28 }
  0x64   : > { %v252_v13 = vunpack.c.l.bf16 %v251_v6  ;;  %v713_v23 = vpack.c.bf16 %v2322_v21, %v2322_v21  ;;  %v560_v24 = vunpack.c.l.bf16 %v559_v22  ;;  %v1020_v31 = vpack.c.bf16 %v2336_v29, %v2336_v29  ;;  %v2350_v37 = vld [vmem:[%s3118_s28 + $0x18] sm:$0x1]  ;;  %s2376_s21 = sld [smem:[#allocation7 + $0x11]]  ;;  %s2375_s23 = sld [smem:[#allocation7 + $0x10]] }
  0x65   : > { %v236_v8 = vadd.s32 8, %v235_v4  ;;  %v239_v10 = vmul.u32 2, %v235_v4  ;;  %v406_v14 = vunpack.c.l.bf16 %v405_v7  ;;  %v867_v32 = vunpack.c.l.bf16 %v866_v30  ;;  %s2378_s29 = sld [smem:[#allocation7 + $0x13]]  ;;  %s2377_s6 = sld [smem:[#allocation7 + $0x12]] }
  0x66   : > { %v253_v17 = vsub.f32 %v250_v1, %v252_v13  ;;  %v714_v25 = vunpack.c.l.bf16 %v713_v23  ;;  %v561_v26 = vsub.f32 %v2315_v20, %v560_v24  ;;  %v1021_v33 = vunpack.c.l.bf16 %v1020_v31  ;;  %s2380_s30 = sld [smem:[#allocation7 + $0x15]]  ;;  %s2379_s7 = sld [smem:[#allocation7 + $0x14]] }
  0x67   : > { %v240_v11 = vmul.u32 2, %v236_v8  ;;  %v241_v12 = vadd.s32 1, %v239_v10  ;;  %v407_v18 = vsub.f32 %v404_v3, %v406_v14  ;;  %v868_v34 = vsub.f32 %v2329_v28, %v867_v32  ;;  %s2382_s9 = sld [smem:[#allocation7 + $0x17]]  ;;  %s2381_s20 = sld [smem:[#allocation7 + $0x16]] }
  0x68   : > { %v715_v27 = vsub.f32 %v2322_v21, %v714_v25  ;;  %v1022_v35 = vsub.f32 %v2336_v29, %v1021_v33  ;;  %v1173_v38 = vpack.c.bf16 %v2343_v36, %v2343_v36  ;;  %v1327_v39 = vpack.c.bf16 %v2350_v37, %v2350_v37  ;;  %s2943_s19 = smov 127   ;;  %s2365_s4 = sld [smem:[#allocation7 + $0x6]] }
  0x69   : > { %v242_v15 = vadd.s32 1, %v240_v11  ;;  %vm243_vm1 = vcmp.eq.s32.totalorder %v238_v9, %v241_v12  ;;  %vm401_vm5 = vcmask 269312   ;;  %vm554_vm6 = vcmask 262144   ;;  %s2363_s5 = sld [smem:[#allocation7 + $0x4]]  ;;  %s2366_s10 = sld [smem:[#allocation7 + $0x7]] }
  0x6a   : > { %v1174_v40 = vunpack.c.l.bf16 %v1173_v38  ;;  %v1328_v41 = vunpack.c.l.bf16 %v1327_v39  ;;  %v1600_v48 = vstv %s2376_s21  ;;  %v1592_v49 = vstv %s2375_s23  ;;  %s2364_s11 = sld [smem:[#allocation7 + $0x5]]  ;;  %s2944_s27 = smov 126  }
  0x6b   : > { %vm244_vm2 = vcmp.eq.s32.totalorder %v238_v9, %v242_v15  ;;  %v1616_v53 = vstv %s2378_s29  ;;  %v1608_v54 = vstv %s2377_s6  ;;  %s2368_s28 = sld [smem:[#allocation7 + $0x9]]  ;;  %s2367_s21 = sld [smem:[#allocation7 + $0x8]]  ;;  %vm2141_vm7 = vcmask 252928  }
  0x6c   : > { %vm3140_vm3 = vmpackc.low %vm244_vm2, %vm243_vm1  ;;  %v1175_v42 = vsub.f32 %v2343_v36, %v1174_v40  ;;  %v1329_v43 = vsub.f32 %v2350_v37, %v1328_v41  ;;  %v1632_v61 = vstv %s2380_s30  ;;  %v1624_v62 = vstv %s2379_s7  ;;  %s2370_s23 = sld [smem:[#allocation7 + $0xb]]  ;;  %s2369_s29 = sld [smem:[#allocation7 + $0xa]] }
  0x6d   : > { %2627 = vmatpush3.bf16.msk.msra.mxu0 %vm3140_vm3, %v2942_v19  ;;  %2633 = vmatpush3.bf16.msk.msra.mxu1 %vm3140_vm3, %v2942_v19  ;;  %v1648_v1 = vstv %s2382_s9  ;;  %s2400_s6 = sld [smem:[#allocation7 + $0x29]]  ;;  %s2399_s30 = sld [smem:[#allocation7 + $0x28]] }
  0x6e   : > { %2628 = vmatprep.subr.bf16.mxu0 %v2939_v2  ;;  %2634 = vmatprep.subr.bf16.mxu1 %v2939_v2  ;;  %v1527_v7 = vstv %s2365_s4  ;;  %s2402_s7 = sld [smem:[#allocation7 + $0x2b]]  ;;  %s2401_s9 = sld [smem:[#allocation7 + $0x2a]] }
  0x6f   : > { %v1511_v8 = vstv %s2363_s5  ;;  %v1535_v15 = vstv %s2366_s10  ;;  %s2403_s4 = sld [smem:[#allocation7 + $0x2c]]  ;;  %s2406_s5 = sld [smem:[#allocation7 + $0x2f]] }
  0x70   : > { %2518 = vmatmul.mubr.msk.f32.vlgmr.msra.gmra.mrb[0].mxu0 %vm254_vm4, %v253_v17  ;;  %2532 = vmatmul.mubr.msk.f32.vlgmr.msra.gmra.mrb[0].mxu1 %vm254_vm4, %v407_v18  ;;  %v1519_v16 = vstv %s2364_s11  ;;  %s2405_s10 = sld [smem:[#allocation7 + $0x2e]]  ;;  %s2388_s11 = sld [smem:[#allocation7 + $0x1d]] }
  0x71   : > { %2630 = vmatpush3.bf16.msk.msra.mxu0 %vm3140_vm3, %v2942_v19  ;;  %2636 = vmatpush3.bf16.msk.msra.mxu1 %vm3140_vm3, %v2942_v19  ;;  %v1543_v20 = vstv %s2367_s21  ;;  %s2390_s21 = sld [smem:[#allocation7 + $0x1f]]  ;;  %p3605_p0 = scmp.ne.s32.totalorder %s3594_s24, 0 }
  0x72   : > { %2524 = vmatprep.mubr.msk.f32.mxu0 %vm2940_vm0, %v2941_v5  ;;  %2538 = vmatprep.mubr.msk.f32.mxu1 %vm2940_vm0, %v2941_v5  ;;  %v1567_v23 = vstv %s2370_s23  ;;  %s2389_s23 = sld [smem:[#allocation7 + $0x1e]] }
  0x73   : > { %2637 = vmatprep.subr.bf16.mxu0 %v2939_v2  ;;  %2643 = vmatprep.subr.bf16.mxu1 %v2939_v2 }
  0x74   : > { %v1778_v36 = vstv %s2402_s7  ;;  %v1770_v37 = vstv %s2401_s9  ;;  %s2393_s7 = sld [smem:[#allocation7 + $0x22]]  ;;  %s2424_s9 = sld [smem:[#allocation7 + $0x41]] }
  0x78   : > { %2525 = vmatmul.mubr.msk.f32.vlgmr.msra.gmra.mrb[0].mxu0 %vm254_vm4, %v252_v13  ;;  %2539 = vmatmul.mubr.msk.f32.vlgmr.msra.gmra.mrb[0].mxu1 %vm254_vm4, %v406_v14 }
  0x79   : > { %2639 = vmatpush3.bf16.msk.msra.mxu0 %vm3140_vm3, %v2942_v19  ;;  %2645 = vmatpush3.bf16.msk.msra.mxu1 %vm3140_vm3, %v2942_v19 }
  0x7a   : > { %2545 = vmatprep.mubr.msk.f32.mxu0 %vm2940_vm0, %v2941_v5  ;;  %2559 = vmatprep.mubr.msk.f32.mxu1 %vm2940_vm0, %v2941_v5 }
  0x7b   : > { %2640 = vmatprep.subr.bf16.mxu0 %v2939_v2  ;;  %2646 = vmatprep.subr.bf16.mxu1 %v2939_v2 }
  0x7c   : > { %2546 = vmatmul.mubr.msk.f32.vlgmr.msra.gmra.mrb[2].mxu0 %vm254_vm4, %v561_v26  ;;  %2560 = vmatmul.mubr.msk.f32.vlgmr.msra.gmra.mrb[2].mxu1 %vm254_vm4, %v715_v27 }
  0x7d   : > { %2642 = vmatpush3.bf16.msk.msra.mxu0 %vm3140_vm3, %v2942_v19  ;;  %2648 = vmatpush3.bf16.msk.msra.mxu1 %vm3140_vm3, %v2942_v19 }
  0x7e   : > { %2552 = vmatprep.mubr.msk.f32.mxu0 %vm2940_vm0, %v2941_v5  ;;  %2566 = vmatprep.mubr.msk.f32.mxu1 %vm2940_vm0, %v2941_v5 }
  0x7f   : > { %2649 = vmatprep.subr.bf16.mxu0 %v2939_v2  ;;  %2655 = vmatprep.subr.bf16.mxu1 %v2939_v2 }
  0x84   : > { %2553 = vmatmul.mubr.msk.f32.vlgmr.msra.gmra.mrb[2].mxu0 %vm254_vm4, %v560_v24  ;;  %2567 = vmatmul.mubr.msk.f32.vlgmr.msra.gmra.mrb[2].mxu1 %vm254_vm4, %v714_v25  ;;  %v1559_v24 = vstv %s2369_s29  ;;  %s2392_s29 = sld [smem:[#allocation7 + $0x21]] }
  0x85   : > { %2651 = vmatpush3.bf16.msk.msra.mxu0 %vm3140_vm3, %v2942_v19  ;;  %2657 = vmatpush3.bf16.msk.msra.mxu1 %vm3140_vm3, %v2942_v19 }
  0x86   : > { %2573 = vmatprep.mubr.msk.f32.mxu0 %vm2940_vm0, %v2941_v5  ;;  %2587 = vmatprep.mubr.msk.f32.mxu1 %vm2940_vm0, %v2941_v5 }
  0x87   : > { %2652 = vmatprep.subr.bf16.mxu0 %v2939_v2  ;;  %2658 = vmatprep.subr.bf16.mxu1 %v2939_v2 }
  0x88   : > { %2574 = vmatmul.mubr.msk.f32.vlgmr.msra.gmra.mrb[4].mxu0 %vm254_vm4, %v868_v34  ;;  %2588 = vmatmul.mubr.msk.f32.vlgmr.msra.gmra.mrb[4].mxu1 %vm254_vm4, %v1022_v35 }
  0x89   : > { %2654 = vmatpush3.bf16.msk.msra.mxu0 %vm3140_vm3, %v2942_v19  ;;  %2660 = vmatpush3.bf16.msk.msra.mxu1 %vm3140_vm3, %v2942_v19 }
  0x8a   : > { %2580 = vmatprep.mubr.msk.f32.mxu0 %vm2940_vm0, %v2941_v5  ;;  %2594 = vmatprep.mubr.msk.f32.mxu1 %vm2940_vm0, %v2941_v5 }
  0x8b   : > { %2661 = vmatprep.subr.bf16.mxu0 %v2939_v2  ;;  %2667 = vmatprep.subr.bf16.mxu1 %v2939_v2 }
  0x90   : > { %2581 = vmatmul.mubr.msk.f32.vlgmr.msra.gmra.mrb[4].mxu0 %vm254_vm4, %v867_v32  ;;  %2595 = vmatmul.mubr.msk.f32.vlgmr.msra.gmra.mrb[4].mxu1 %vm254_vm4, %v1021_v33  ;;  %v1762_v32 = vstv %s2400_s6  ;;  %v1754_v33 = vstv %s2399_s30  ;;  %s2391_s6 = sld [smem:[#allocation7 + $0x20]]  ;;  %s2394_s30 = sld [smem:[#allocation7 + $0x23]] }
  0x91   : > { %2663 = vmatpush3.bf16.msk.msra.mxu0 %vm3140_vm3, %v2942_v19  ;;  %2669 = vmatpush3.bf16.msk.msra.mxu1 %vm3140_vm3, %v2942_v19 }
  0x92   : > { %2601 = vmatprep.mubr.msk.f32.mxu0 %vm2940_vm0, %v2941_v5  ;;  %2615 = vmatprep.mubr.msk.f32.mxu1 %vm2940_vm0, %v2941_v5 }
  0x93   : > { %2664 = vmatprep.subr.bf16.mxu0 %v2939_v2  ;;  %2670 = vmatprep.subr.bf16.mxu1 %v2939_v2  ;;  %v1640_v2 = vstv %s2381_s20  ;;  %s2404_s20 = sld [smem:[#allocation7 + $0x2d]] }
  0x94   : > { %2602 = vmatmul.mubr.msk.f32.vlgmr.msra.gmra.mrb[6].mxu0 %vm254_vm4, %v1175_v42  ;;  %2616 = vmatmul.mubr.msk.f32.vlgmr.msra.gmra.mrb[6].mxu1 %vm254_vm4, %v1329_v43  ;;  %v1810_v43 = vstv %s2406_s5  ;;  %s2425_s5 = sld [smem:[#allocation7 + $0x42]] }
  0x95   : > { %2666 = vmatpush3.bf16.msk.msra.mxu0 %vm3140_vm3, %v2942_v19  ;;  %2672 = vmatpush3.bf16.msk.msra.mxu1 %vm3140_vm3, %v2942_v19  ;;  %v1551_v19 = vstv %s2368_s28  ;;  %s2387_s28 = sld [smem:[#allocation7 + $0x1c]] }
  0x96   : > { %2608 = vmatprep.mubr.msk.f32.mxu0 %vm2940_vm0, %v2941_v5  ;;  %2622 = vmatprep.mubr.msk.f32.mxu1 %vm2940_vm0, %v2941_v5 }
  0x99   : > { %v1794_v39 = vstv %s2404_s20  ;;  %s2423_s20 = sld [smem:[#allocation7 + $0x40]] }
  0x9c   : > { %2609 = vmatmul.mubr.msk.f32.vlgmr.msra.gmra.mrb[6].mxu0 %vm254_vm4, %v1174_v40  ;;  %2623 = vmatmul.mubr.msk.f32.vlgmr.msra.gmra.mrb[6].mxu1 %vm254_vm4, %v1328_v41  ;;  %v1786_v40 = vstv %s2403_s4  ;;  %s2426_s4 = sld [smem:[#allocation7 + $0x43]] }
 0x14b   : > { %v397_v44 = vpop.f32.mrb[0].mxu0  ;;  %v550_v45 = vpop.f32.mrb[0].mxu1 }
 0x14c   : > { %402 = vst.msk [vmem:[#allocation2 + $0x1] sm:$0xff] %vm401_vm5, %v397_v44  ;;  %v2526_v46 = vpop.f32.mrb[1].mxu0  ;;  %v2540_v47 = vpop.f32.mrb[1].mxu1  ;;  %v1802_v44 = vstv %s2405_s10  ;;  %s2428_s10 = sld [smem:[#allocation7 + $0x45]] }
 0x14d   : > { %555 = vst.msk [vmem:[#allocation2] sm:$0x1] %vm554_vm6, %v550_v45 }
 0x14e   : > { %1481 = vst.msk [vmem:[#allocation2] sm:$0x1] %vm554_vm6, %v2941_v5 }
 0x153   : > { %v3260_v50 = vld [vmem:[#allocation2 + $0x1] sm:$0xff] }
 0x154   : > { %v1601_v51 = vmul.f32 %v1600_v48, %v3260_v50  ;;  %v1593_v52 = vmul.f32 %v1592_v49, %v3260_v50  ;;  %v1617_v57 = vmul.f32 %v1616_v53, %v3260_v50  ;;  %v1609_v58 = vmul.f32 %v1608_v54, %v3260_v50 }
 0x155   : > { %v1633_v63 = vmul.f32 %v1632_v61, %v3260_v50  ;;  %v1625_v0 = vmul.f32 %v1624_v62, %v3260_v50  ;;  %v1649_v3 = vmul.f32 %v1648_v1, %v3260_v50  ;;  %v1641_v4 = vmul.f32 %v1640_v2, %v3260_v50  ;;  %v3280_v6 = vld [vmem:[#allocation2] sm:$0xff] }
 0x156   : > { %1603 = vrot.lane.b32.xlu1 %v1601_v51, %s2943_s19  ;;  %1595 = vrot.lane.b32.xlu0 %v1593_v52, %s2943_s19  ;;  %v1528_v11 = vmul.f32 %v1527_v7, %v3280_v6  ;;  %v1512_v12 = vmul.f32 %v1511_v8, %v3280_v6  ;;  %v1536_v17 = vmul.f32 %v1535_v15, %v3280_v6  ;;  %v1681_v48 = vstv %s2388_s11  ;;  %s2427_s11 = sld [smem:[#allocation7 + $0x44]] }
 0x157   : > { %v704_v55 = vpop.f32.mrb[2].mxu0  ;;  %v858_v56 = vpop.f32.mrb[2].mxu1  ;;  %v1520_v18 = vmul.f32 %v1519_v16, %v3280_v6  ;;  %v1552_v21 = vmul.f32 %v1551_v19, %v3280_v6  ;;  %v1544_v22 = vmul.f32 %v1543_v20, %v3280_v6  ;;  %v1568_v27 = vmul.f32 %v1567_v23, %v3280_v6 }
 0x158   : > { %709 = vst.msk [vmem:[#allocation2 + $0x11] sm:$0xff] %vm401_vm5, %v704_v55  ;;  %v2554_v59 = vpop.f32.mrb[3].mxu0  ;;  %v2568_v60 = vpop.f32.mrb[3].mxu1  ;;  %v1560_v28 = vmul.f32 %v1559_v24, %v3280_v6  ;;  %v1673_v49 = vstv %s2387_s28  ;;  %v1697_v53 = vstv %s2390_s21  ;;  %v1689_v54 = vstv %s2389_s23  ;;  %s2430_s28 = sld [smem:[#allocation7 + $0x47]]  ;;  %s2429_s21 = sld [smem:[#allocation7 + $0x46]] }
 0x159   : > { %862 = vst.msk [vmem:[#allocation2 + $0x10] sm:$0x1] %vm554_vm6, %v858_v56  ;;  %v1729_v61 = vstv %s2394_s30  ;;  %v1721_v62 = vstv %s2393_s7  ;;  %v1924_v2 = vstv %s2424_s9  ;;  %v1940_v8 = vstv %s2426_s4  ;;  %s2412_s23 = sld [smem:[#allocation7 + $0x35]]  ;;  %s2413_s30 = sld [smem:[#allocation7 + $0x36]] }
 0x15a   : > { %1482 = vst.msk [vmem:[#allocation2 + $0x10] sm:$0x1] %vm554_vm6, %v2941_v5  ;;  %1619 = vrot.lane.b32.xlu1 %v1617_v57, %s2943_s19  ;;  %1611 = vrot.lane.b32.xlu0 %v1609_v58, %s2943_s19  ;;  %v1713_v57 = vstv %s2392_s29  ;;  %v1705_v58 = vstv %s2391_s6  ;;  %s2411_s29 = sld [smem:[#allocation7 + $0x34]]  ;;  %s2414_s6 = sld [smem:[#allocation7 + $0x37]] }
 0x15b   : > { %s2416_s7 = sld [smem:[#allocation7 + $0x39]]  ;;  %s2415_s9 = sld [smem:[#allocation7 + $0x38]] }
 0x15c   : > { %s2417_s4 = sld [smem:[#allocation7 + $0x3a]] }
 0x15e   : > { %1635 = vrot.lane.b32.xlu1 %v1633_v63, %s2944_s27  ;;  %1627 = vrot.lane.b32.xlu0 %v1625_v0, %s2944_s27  ;;  %v1972_v16 = vstv %s2430_s28  ;;  %s2449_s28 = sld [smem:[#allocation7 + $0x5a]] }
 0x15f   : > { %v3304_v31 = vld [vmem:[#allocation2 + $0x11] sm:$0xff] }
 0x160   : > { %v1763_v34 = vmul.f32 %v1762_v32, %v3304_v31  ;;  %v1755_v35 = vmul.f32 %v1754_v33, %v3304_v31  ;;  %v1779_v38 = vmul.f32 %v1778_v36, %v3304_v31  ;;  %v1795_v41 = vmul.f32 %v1794_v39, %v3304_v31 }
 0x161   : > { %v1787_v42 = vmul.f32 %v1786_v40, %v3304_v31  ;;  %v1811_v45 = vmul.f32 %v1810_v43, %v3304_v31  ;;  %v1803_v46 = vmul.f32 %v1802_v44, %v3304_v31  ;;  %v3324_v47 = vld [vmem:[#allocation2 + $0x10] sm:$0xff] }
 0x162   : > { %1651 = vrot.lane.b32.xlu1 %v1649_v3, %s2944_s27  ;;  %1643 = vrot.lane.b32.xlu0 %v1641_v4, %s2944_s27  ;;  %v1682_v51 = vmul.f32 %v1681_v48, %v3324_v47  ;;  %v1674_v52 = vmul.f32 %v1673_v49, %v3324_v47  ;;  %v1698_v55 = vmul.f32 %v1697_v53, %v3324_v47  ;;  %v1916_v3 = vstv %s2423_s20  ;;  %s2418_s20 = sld [smem:[#allocation7 + $0x3b]] }
 0x163   : > { %v1011_v9 = vpop.f32.mrb[4].mxu0  ;;  %v1165_v10 = vpop.f32.mrb[4].mxu1  ;;  %v1690_v56 = vmul.f32 %v1689_v54, %v3324_v47  ;;  %v1714_v59 = vmul.f32 %v1713_v57, %v3324_v47  ;;  %v1706_v60 = vmul.f32 %v1705_v58, %v3324_v47  ;;  %v1730_v63 = vmul.f32 %v1729_v61, %v3324_v47 }
 0x164   : > { %1016 = vst.msk [vmem:[#allocation2 + $0x21] sm:$0xff] %vm401_vm5, %v1011_v9  ;;  %v2582_v13 = vpop.f32.mrb[5].mxu0  ;;  %v2596_v14 = vpop.f32.mrb[5].mxu1  ;;  %v1722_v0 = vmul.f32 %v1721_v62, %v3324_v47  ;;  %v1932_v9 = vstv %s2425_s5  ;;  %s2448_s5 = sld [smem:[#allocation7 + $0x59]]  ;;  %v2094_v43 = vstv %s2449_s28  ;;  %s2358_s28 = sld [smem:[#allocation8 + $0x2]] }
 0x165   : > { %1169 = vst.msk [vmem:[#allocation2 + $0x20] sm:$0x1] %vm554_vm6, %v1165_v10  ;;  %v1948_v13 = vstv %s2427_s11  ;;  %s2450_s11 = sld [smem:[#allocation7 + $0x5b]] }
 0x166   : > { %1483 = vst.msk [vmem:[#allocation2 + $0x20] sm:$0x1] %vm554_vm6, %v2941_v5  ;;  %1530 = vrot.lane.b32.xlu1 %v1528_v11, %s2943_s19  ;;  %1514 = vrot.lane.b32.xlu0 %v1512_v12, %s2943_s19  ;;  %v1956_v12 = vstv %s2428_s10  ;;  %s2447_s10 = sld [smem:[#allocation7 + $0x58]] }
 0x16a   : > { %1538 = vrot.lane.b32.xlu1 %v1536_v17, %s2943_s19  ;;  %1522 = vrot.lane.b32.xlu0 %v1520_v18, %s2943_s19  ;;  %v1964_v17 = vstv %s2429_s21  ;;  %s2436_s21 = sld [smem:[#allocation7 + $0x4d]] }
 0x16b   : > { %v3342_v1 = vld [vmem:[#allocation2 + $0x21] sm:$0xff] }
 0x16c   : > { %v1925_v4 = vmul.f32 %v1924_v2, %v3342_v1  ;;  %v1917_v7 = vmul.f32 %v1916_v3, %v3342_v1  ;;  %v1941_v10 = vmul.f32 %v1940_v8, %v3342_v1  ;;  %v1933_v11 = vmul.f32 %v1932_v9, %v3342_v1 }
 0x16d   : > { %v1957_v14 = vmul.f32 %v1956_v12, %v3342_v1  ;;  %v1949_v15 = vmul.f32 %v1948_v13, %v3342_v1  ;;  %v1973_v18 = vmul.f32 %v1972_v16, %v3342_v1  ;;  %v1965_v19 = vmul.f32 %v1964_v17, %v3342_v1  ;;  %v3360_v20 = vld [vmem:[#allocation2 + $0x20] sm:$0xff] }
 0x16e   : > { %1554 = vrot.lane.b32.xlu1 %v1552_v21, %s2944_s27  ;;  %1546 = vrot.lane.b32.xlu0 %v1544_v22, %s2944_s27  ;;  %v1843_v21 = vstv %s2412_s23  ;;  %v1835_v22 = vstv %s2411_s29  ;;  %s2435_s23 = sld [smem:[#allocation7 + $0x4c]]  ;;  %s2438_s29 = sld [smem:[#allocation7 + $0x4f]] }
 0x16f   : > { %v1318_v25 = vpop.f32.mrb[6].mxu0  ;;  %v1472_v26 = vpop.f32.mrb[6].mxu1  ;;  %v1844_v23 = vmul.f32 %v1843_v21, %v3360_v20  ;;  %v1836_v24 = vmul.f32 %v1835_v22, %v3360_v20  ;;  %v2078_v39 = vstv %s2447_s10  ;;  %s2454_s10 = sld [smem:[#allocation7 + $0x5f]] }
 0x170   : > { %1323 = vst.msk [vmem:[#allocation2 + $0x31] sm:$0xff] %vm401_vm5, %v1318_v25  ;;  %v2610_v29 = vpop.f32.mrb[7].mxu0  ;;  %v2624_v30 = vpop.f32.mrb[7].mxu1  ;;  %v1859_v25 = vstv %s2414_s6  ;;  %s2437_s6 = sld [smem:[#allocation7 + $0x4e]]  ;;  %v2005_v48 = vstv %s2436_s21  ;;  %s1494_s21 = sld [smem:[#allocation7]] }
 0x171   : > { %1476 = vst.msk [vmem:[#allocation2 + $0x30] sm:$0x1] %vm554_vm6, %v1472_v26  ;;  %v1851_v26 = vstv %s2413_s30  ;;  %v1875_v29 = vstv %s2416_s7  ;;  %v1867_v30 = vstv %s2415_s9  ;;  %s2440_s30 = sld [smem:[#allocation7 + $0x51]]  ;;  %s2439_s7 = sld [smem:[#allocation7 + $0x50]] }
 0x172   : > { %1484 = vst.msk [vmem:[#allocation2 + $0x30] sm:$0x1] %vm554_vm6, %v2941_v5  ;;  %1570 = vrot.lane.b32.xlu1 %v1568_v27, %s2944_s27  ;;  %1562 = vrot.lane.b32.xlu0 %v1560_v28, %s2944_s27  ;;  %v1771_v5 = vmul.f32 %v1770_v37, %v3304_v31  ;;  %v1860_v27 = vmul.f32 %v1859_v25, %v3360_v20  ;;  %s2442_s9 = sld [smem:[#allocation7 + $0x53]] }
 0x173   : > { %v1852_v28 = vmul.f32 %v1851_v26, %v3360_v20  ;;  %v1876_v32 = vmul.f32 %v1875_v29, %v3360_v20  ;;  %v1868_v33 = vmul.f32 %v1867_v30, %v3360_v20 }
 0x174   : > { %v1997_v49 = vstv %s2435_s23  ;;  %v2021_v53 = vstv %s2438_s29  ;;  %s2360_s23 = sld [smem:[#allocation7 + $0x1]]  ;;  %s1485_s29 = sld [smem:[#allocation8]] }
 0x175   : > { %v2134_v12 = vstv %s2454_s10  ;;  %s3445_s10 = sld [smem:[#allocation7 + $0x18]] }
 0x176   : > { %1765 = vrot.lane.b32.xlu1 %v1763_v34, %s2943_s19  ;;  %1757 = vrot.lane.b32.xlu0 %v1755_v35, %s2943_s19  ;;  %v1891_v34 = vstv %s2418_s20  ;;  %v1883_v35 = vstv %s2417_s4  ;;  %s2441_s20 = sld [smem:[#allocation7 + $0x52]]  ;;  %s2452_s4 = sld [smem:[#allocation7 + $0x5d]] }
 0x177   : > { %v1892_v36 = vmul.f32 %v1891_v34, %v3360_v20  ;;  %v1884_v37 = vmul.f32 %v1883_v35, %v3360_v20  ;;  %v2013_v54 = vstv %s2437_s6  ;;  %v2037_v57 = vstv %s2440_s30  ;;  %s2362_s6 = sld [smem:[#allocation7 + $0x3]]  ;;  %s2357_s30 = sld [smem:[#allocation8 + $0x1]] }
 0x178   : > { %v2029_v58 = vstv %s2439_s7  ;;  %v2053_v61 = vstv %s2442_s9  ;;  %s2372_s7 = sld [smem:[#allocation7 + $0xd]]  ;;  %s3433_s9 = sld [smem:[#allocation8 + $0x3]] }
 0x17a   : > { %1781 = vrot.lane.b32.xlu1 %v1779_v38, %s2943_s19  ;;  %1773 = vrot.lane.b32.xlu0 %v1771_v5, %s2943_s19  ;;  %v3378_v38 = vld [vmem:[#allocation2 + $0x31] sm:$0xff]  ;;  %v2086_v5 = vstv %s2448_s5  ;;  %s2451_s5 = sld [smem:[#allocation7 + $0x5c]]  ;;  %v1499_v25 = vstv %s2360_s23  ;;  %s2398_s23 = sld [smem:[#allocation7 + $0x27]] }
 0x17b   : > { %v2087_v40 = vmul.f32 %v2086_v5, %v3378_v38  ;;  %v2135_v16 = vmul.f32 %v2134_v12, %v3378_v38 }
 0x17c   : > { %v2045_v62 = vstv %s2441_s20  ;;  %s3435_s20 = sld [smem:[#allocation7 + $0xc]] }
 0x17d   : > { %v1507_v34 = vstv %s2362_s6  ;;  %v1488_v35 = vstv %s2357_s30  ;;  %s3476_s6 = sld [smem:[#allocation7 + $0x31]]  ;;  %s3478_s30 = sld [smem:[#allocation7 + $0x30]] }
 0x17e   : > { %1797 = vrot.lane.b32.xlu1 %v1795_v41, %s2944_s27  ;;  %1789 = vrot.lane.b32.xlu0 %v1787_v42, %s2944_s27  ;;  %v2079_v41 = vmul.f32 %v2078_v39, %v3378_v38  ;;  %v2102_v42 = vstv %s2450_s11  ;;  %s2453_s11 = sld [smem:[#allocation7 + $0x5e]]  ;;  %v1508_v39 = vmul.f32 %v1507_v34, %v3280_v6 }
 0x17f   : > { %v2103_v44 = vmul.f32 %v2102_v42, %v3378_v38  ;;  %v1492_v42 = vstv %s3433_s9  ;;  %s3482_s9 = sld [smem:[#allocation7 + $0x32]] }
 0x182   : > { %1813 = vrot.lane.b32.xlu1 %v1811_v45, %s2944_s27  ;;  %1805 = vrot.lane.b32.xlu0 %v1803_v46, %s2944_s27  ;;  %v2095_v45 = vmul.f32 %v2094_v43, %v3378_v38  ;;  %v3388_v46 = vld [vmem:[#allocation2 + $0x30] sm:$0xff]  ;;  %v1576_v43 = vstv %s3435_s20  ;;  %s2420_s20 = sld [smem:[#allocation7 + $0x3d]] }
 0x183   : > { %v2054_v2 = vmul.f32 %v2053_v61, %v3388_v46  ;;  %v2046_v3 = vmul.f32 %v2045_v62, %v3388_v46  ;;  %v1657_v61 = vstv %s3445_s10  ;;  %s3496_s10 = sld [smem:[#allocation7 + $0x49]] }
 0x184   : > { %v2126_v13 = vstv %s2453_s11  ;;  %s3453_s11 = sld [smem:[#allocation7 + $0x1b]] }
 0x185   : > { %v2127_v17 = vmul.f32 %v2126_v13, %v3378_v38 }
 0x186   : > { %1684 = vrot.lane.b32.xlu1 %v1682_v51, %s2943_s19  ;;  %1676 = vrot.lane.b32.xlu0 %v1674_v52, %s2943_s19  ;;  %v2006_v51 = vmul.f32 %v2005_v48, %v3388_v46  ;;  %v1998_v52 = vmul.f32 %v1997_v49, %v3388_v46 }
 0x18a   : > { %1700 = vrot.lane.b32.xlu1 %v1698_v55, %s2943_s19  ;;  %1692 = vrot.lane.b32.xlu0 %v1690_v56, %s2943_s19  ;;  %v2022_v55 = vmul.f32 %v2021_v53, %v3388_v46  ;;  %v2014_v56 = vmul.f32 %v2013_v54, %v3388_v46  ;;  %v1509_v54 = vadd.f32 %v1508_v39, %v1492_v42 }
 0x18e   : > { %1716 = vrot.lane.b32.xlu1 %v1714_v59, %s2944_s27  ;;  %1708 = vrot.lane.b32.xlu0 %v1706_v60, %s2944_s27  ;;  %v2038_v59 = vmul.f32 %v2037_v57, %v3388_v46  ;;  %v2030_v60 = vmul.f32 %v2029_v58, %v3388_v46 }
 0x192   : > { %1732 = vrot.lane.b32.xlu1 %v1730_v63, %s2944_s27  ;;  %1724 = vrot.lane.b32.xlu0 %v1722_v0, %s2944_s27 }
 0x196   : > { %1927 = vrot.lane.b32.xlu1 %v1925_v4, %s2943_s19  ;;  %1919 = vrot.lane.b32.xlu0 %v1917_v7, %s2943_s19  ;;  %v2118_v4 = vstv %s2452_s4  ;;  %v2110_v7 = vstv %s2451_s5  ;;  %s3439_s4 = sld [smem:[#allocation7 + $0xe]]  ;;  %s3443_s5 = sld [smem:[#allocation7 + $0x19]] }
 0x19a   : > { %1943 = vrot.lane.b32.xlu1 %v1941_v10, %s2943_s19  ;;  %1935 = vrot.lane.b32.xlu0 %v1933_v11, %s2943_s19  ;;  %v2119_v10 = vmul.f32 %v2118_v4, %v3378_v38  ;;  %v2111_v11 = vmul.f32 %v2110_v7, %v3378_v38 }
 0x19c   : > { %v1584_v53 = vstv %s3439_s4  ;;  %v1661_v57 = vstv %s3443_s5  ;;  %s2422_s4 = sld [smem:[#allocation7 + $0x3f]]  ;;  %s2421_s5 = sld [smem:[#allocation7 + $0x3e]] }
 0x19d   : > { %v1662_v13 = vmul.f32 %v1661_v57, %v3324_v47 }
 0x19e   : > { %1959 = vrot.lane.b32.xlu1 %v1957_v14, %s2944_s27  ;;  %1951 = vrot.lane.b32.xlu0 %v1949_v15, %s2944_s27 }
 0x1a2   : > { %1975 = vrot.lane.b32.xlu1 %v1973_v18, %s2944_s27  ;;  %1967 = vrot.lane.b32.xlu0 %v1965_v19, %s2944_s27 }
 0x1a6   : > { %1846 = vrot.lane.b32.xlu1 %v1844_v23, %s2943_s19  ;;  %1838 = vrot.lane.b32.xlu0 %v1836_v24, %s2943_s19  ;;  %v1490_v23 = vstv %s2358_s28  ;;  %v1495_v24 = vstv %s1494_s21  ;;  %s2396_s28 = sld [smem:[#allocation7 + $0x25]]  ;;  %s2395_s21 = sld [smem:[#allocation7 + $0x24]] }
 0x1a7   : > { %v1496_v30 = vmul.f32 %v1495_v24, %v3280_v6 }
 0x1aa   : > { %1862 = vrot.lane.b32.xlu1 %v1860_v27, %s2943_s19  ;;  %1854 = vrot.lane.b32.xlu0 %v1852_v28, %s2943_s19 }
 0x1ae   : > { %1878 = vrot.lane.b32.xlu1 %v1876_v32, %s2944_s27  ;;  %1870 = vrot.lane.b32.xlu0 %v1868_v33, %s2944_s27  ;;  %v1500_v32 = vmul.f32 %v1499_v25, %v3280_v6  ;;  %v1486_v33 = vstv %s1485_s29  ;;  %s2397_s29 = sld [smem:[#allocation7 + $0x26]] }
 0x1af   : > { %v1497_v5 = vadd.f32 %v1496_v30, %v1486_v33 }
 0x1b2   : > { %1894 = vrot.lane.b32.xlu1 %v1892_v36, %s2944_s27  ;;  %1886 = vrot.lane.b32.xlu0 %v1884_v37, %s2944_s27 }
 0x1b6   : > { %2089 = vrot.lane.b32.xlu1 %v2087_v40, %s2943_s19  ;;  %2081 = vrot.lane.b32.xlu0 %v2079_v41, %s2943_s19  ;;  %v1501_v40 = vadd.f32 %v1500_v32, %v1488_v35  ;;  %v1580_v41 = vstv %s2372_s7  ;;  %s3480_s7 = sld [smem:[#allocation7 + $0x33]] }
 0x1b7   : > { %v1581_v48 = vmul.f32 %v1580_v41, %v3260_v50 }
 0x1ba   : > { %2105 = vrot.lane.b32.xlu1 %v2103_v44, %s2943_s19  ;;  %2097 = vrot.lane.b32.xlu0 %v2095_v45, %s2943_s19 }
 0x1be   : > { %2008 = vrot.lane.b32.xlu1 %v2006_v51, %s2943_s19  ;;  %2000 = vrot.lane.b32.xlu0 %v1998_v52, %s2943_s19 }
 0x1c2   : > { %2024 = vrot.lane.b32.xlu1 %v2022_v55, %s2943_s19  ;;  %2016 = vrot.lane.b32.xlu0 %v2014_v56, %s2943_s19  ;;  %s2361_s19 = sld [smem:[#allocation7 + $0x2]]  ;;  %v1577_v55 = vmul.f32 %v1576_v43, %v3260_v50 }
 0x1c6   : > { %2040 = vrot.lane.b32.xlu1 %v2038_v59, %s2944_s27  ;;  %2032 = vrot.lane.b32.xlu0 %v2030_v60, %s2944_s27 }
 0x1c8   : > { %v3404_v63 = vpop.permute.xlu1 %1603  ;;  %v3406_v0 = vpop.permute.xlu0 %1595  ;;  %v1503_v18 = vstv %s2361_s19  ;;  %s3455_s19 = sld [smem:[#allocation7 + $0x1a]] }
 0x1c9   : > { %v1504_v19 = vmul.f32 %v1503_v18, %v3280_v6 }
 0x1ca   : > { %2056 = vrot.lane.b32.xlu1 %v2054_v2, %s2944_s27  ;;  %2048 = vrot.lane.b32.xlu0 %v2046_v3, %s2944_s27  ;;  %v1585_v3 = vmul.f32 %v1584_v53, %v3260_v50 }
 0x1cb   : > { %v1505_v26 = vadd.f32 %v1504_v19, %v1490_v23 }
 0x1cc   : > { %v3412_v8 = vpop.permute.xlu1 %1619  ;;  %v3414_v9 = vpop.permute.xlu0 %1611 }
 0x1ce   : > { %2121 = vrot.lane.b32.xlu1 %v2119_v10, %s2944_s27  ;;  %2113 = vrot.lane.b32.xlu0 %v2111_v11, %s2944_s27 }
 0x1d0   : > { %v3420_v14 = vpop.permute.xlu1 %1635  ;;  %v3422_v15 = vpop.permute.xlu0 %1627 }
 0x1d2   : > { %2137 = vrot.lane.b32.xlu1 %v2135_v16, %s2944_s27  ;;  %2129 = vrot.lane.b32.xlu0 %v2127_v17, %s2944_s27  ;;  %s3437_s27 = sld [smem:[#allocation7 + $0xf]]  ;;  %v1658_v16 = vmul.f32 %v1657_v61, %v3324_v47 }
 0x1d4   : > { %v3429_v21 = vpop.permute.xlu1 %1651  ;;  %v3431_v22 = vpop.permute.xlu0 %1643 }
 0x1d8   : > { %v1531_v27 = vpop.permute.xlu1 %1530  ;;  %v1515_v28 = vpop.permute.xlu0 %1514  ;;  %v1588_v52 = vstv %s3437_s27  ;;  %s2419_s27 = sld [smem:[#allocation7 + $0x3c]] }
 0x1d9   : > { %v1533_v29 = vadd.f32 %v1531_v27, %v1505_v26  ;;  %v1517_v44 = vadd.f32 %v1515_v28, %v1497_v5  ;;  %v1589_v62 = vmul.f32 %v1588_v52, %v3260_v50  ;;  %v1669_v50 = vstv %s3453_s11  ;;  %s3498_s11 = sld [smem:[#allocation7 + $0x48]] }
 0x1da   : > { %v1665_v26 = vstv %s3455_s19  ;;  %v1670_v30 = vmul.f32 %v1669_v50, %v3324_v47  ;;  %v1827_v50 = vstv %s3482_s9  ;;  %s3500_s19 = sld [smem:[#allocation7 + $0x4b]]  ;;  %s2464_s9 = sshll.u32 %s2924_s15, 9 }
 0x1db   : > { %s2150_s15 = scalar_lea.sflag [#allocation5], %s3112_s26 }
 0x1dc   : > { %v1539_v36 = vpop.permute.xlu1 %1538  ;;  %v1523_v37 = vpop.permute.xlu0 %1522 }
 0x1dd   : > { %v1525_v45 = vadd.f32 %v1523_v37, %v1501_v40  ;;  %v1541_v58 = vadd.f32 %v1539_v36, %v1509_v54  ;;  %v1738_v40 = vstv %s2395_s21  ;;  %v1823_v54 = vstv %s3476_s6  ;;  %s2444_s21 = sld [smem:[#allocation7 + $0x55]]  ;;  %s2445_s6 = sld [smem:[#allocation7 + $0x56]] }
 0x1de   : > { %v1739_v52 = vmul.f32 %v1738_v40, %v3304_v31  ;;  %v1912_v40 = vstv %s2422_s4 }
 0x1e0   : > { %v1555_v49 = vpop.permute.xlu1 %1554  ;;  %v1547_v51 = vpop.permute.xlu0 %1546 }
 0x1e1   : > { %v1557_v6 = vadd.f32 %v1555_v49, %v1525_v45  ;;  %v1549_v56 = vadd.f32 %v1547_v51, %v1517_v44  ;;  %v1750_v45 = vstv %s2398_s23  ;;  %s2443_s23 = sld [smem:[#allocation7 + $0x54]] }
 0x1e3   : > { %v1582_v59 = vadd.f32 %v1581_v48, %v1557_v6  ;;  %v1578_v60 = vadd.f32 %v1577_v55, %v1549_v56  ;;  %v1746_v48 = vstv %s2397_s29  ;;  %v1819_v6 = vstv %s3478_s30  ;;  %s2446_s29 = sld [smem:[#allocation7 + $0x57]]  ;;  %s229_s30 = scalar_lea.vmem [#allocation10], %s2297_s22 }
 0x1e4   : > { %v1571_v2 = vpop.permute.xlu1 %1570  ;;  %v1563_v4 = vpop.permute.xlu0 %1562  ;;  %v1747_v61 = vmul.f32 %v1746_v48, %v3304_v31  ;;  %v1985_v48 = vstv %s3496_s10 }
 0x1e5   : > { %v1606_v7 = vadd.f32 %v3404_v63, %v1582_v59  ;;  %v1598_v10 = vadd.f32 %v3406_v0, %v1578_v60  ;;  %v1573_v11 = vadd.f32 %v1571_v2, %v1541_v58  ;;  %v1565_v12 = vadd.f32 %v1563_v4, %v1533_v29 }
 0x1e6   : > { %v1751_v59 = vmul.f32 %v1750_v45, %v3304_v31 }
 0x1e7   : > { %v1590_v17 = vadd.f32 %v1589_v62, %v1573_v11  ;;  %v1586_v18 = vadd.f32 %v1585_v3, %v1565_v12  ;;  %v1638_v19 = vadd.f32 %v3420_v14, %v1606_v7  ;;  %v1630_v23 = vadd.f32 %v3422_v15, %v1598_v10 }
 0x1e8   : > { %v1766_v24 = vpop.permute.xlu1 %1765  ;;  %v1758_v25 = vpop.permute.xlu0 %1757  ;;  %v1666_v14 = vmul.f32 %v1665_v26, %v3324_v47  ;;  %v1824_v10 = vmul.f32 %v1823_v54, %v3360_v20  ;;  %v1820_v11 = vmul.f32 %v1819_v6, %v3360_v20  ;;  %v1913_v6 = vmul.f32 %v1912_v40, %v3342_v1 }
 0x1e9   : > { %v1622_v63 = vadd.f32 %v3412_v8, %v1590_v17  ;;  %v1614_v0 = vadd.f32 %v3414_v9, %v1586_v18  ;;  %v1663_v27 = vadd.f32 %v1662_v13, %v1638_v19  ;;  %v1659_v28 = vadd.f32 %v1658_v16, %v1630_v23 }
 0x1ea   : > { %v1831_v23 = vstv %s3480_s7  ;;  %s2164_s7 = sshll.u32 %s229_s30, 4  ;;  %s3524_s7 = int_to_ptr.vmem [resolvable:$true] %s2164_s7 }
 0x1eb   : > { %v1654_v29 = vadd.f32 %v3429_v21, %v1622_v63  ;;  %v1646_v32 = vadd.f32 %v3431_v22, %v1614_v0  ;;  %v1742_v22 = vstv %s2396_s28  ;;  %s3502_s28 = sld [smem:[#allocation7 + $0x4a]]  ;;  %s2842_s4 = scalar_lea.vmem %s3524_s7, 512 }
 0x1ec   : > { %v1782_v33 = vpop.permute.xlu1 %1781  ;;  %v1774_v15 = vpop.permute.xlu0 %1773  ;;  %v1743_v49 = vmul.f32 %v1742_v22, %v3304_v31  ;;  %p2843_p5 = scmp.ne.s32.totalorder %s3524_s7, %s2842_s4 }
 0x1ed   : > { %v1671_v34 = vadd.f32 %v1670_v30, %v1654_v29  ;;  %v1667_v35 = vadd.f32 %v1666_v14, %v1646_v32 }
 0x1ee   : > { %p2844_p1 = pnand %p2843_p5, %p3605_p0 }
 0x1f0   : > { %v1798_v36 = vpop.permute.xlu1 %1797  ;;  %v1790_v37 = vpop.permute.xlu0 %1789  ;;  %p2845_p6 = pneg %p2844_p1 }
 0x1f4   : > { %v1814_v5 = vpop.permute.xlu1 %1813  ;;  %v1806_v8 = vpop.permute.xlu0 %1805 }
 0x1f8   : > { %v1685_v9 = vpop.permute.xlu1 %1684  ;;  %v1677_v39 = vpop.permute.xlu0 %1676 }
 0x1f9   : > { %v1687_v41 = vadd.f32 %v1685_v9, %v1663_v27  ;;  %v1679_v42 = vadd.f32 %v1677_v39, %v1659_v28  ;;  %v1828_v28 = vmul.f32 %v1827_v50, %v3360_v20  ;;  %v1900_v9 = vstv %s2419_s27  ;;  %s3530_s27 = scalar_lea.hbm %s3584_s3, %s2464_s9 }
 0x1fc   : > { %v1701_v21 = vpop.permute.xlu1 %1700  ;;  %v1693_v47 = vpop.permute.xlu0 %1692 }
 0x1fd   : > { %v1703_v55 = vadd.f32 %v1701_v21, %v1671_v34  ;;  %v1695_v56 = vadd.f32 %v1693_v47, %v1667_v35 }
 0x200   : > { %v1717_v43 = vpop.permute.xlu1 %1716  ;;  %v1709_v44 = vpop.permute.xlu0 %1708 }
 0x201   : > { %v1719_v51 = vadd.f32 %v1717_v43, %v1687_v41  ;;  %v1711_v53 = vadd.f32 %v1709_v44, %v1679_v42  ;;  %v1908_v41 = vstv %s2421_s5  ;;  %v1901_v44 = vmul.f32 %v1900_v9, %v3342_v1  ;;  %s2945_s5 = smov [#allocation10]  }
 0x202   : > { %s2846_s10 = sshll.u32 %s2945_s5, 4  ;;  %s2847_s10 = int_to_ptr.vmem [resolvable:$false] %s2846_s10 }
 0x203   : > { %v1744_v57 = vadd.f32 %v1743_v49, %v1719_v51  ;;  %v1740_v58 = vadd.f32 %v1739_v52, %v1711_v53  ;;  %v1981_v49 = vstv %s3498_s11  ;;  %s2848_s11 = scalar_lea.vmem %s2847_s10, 1024  ;;  %p2849_p11 = scmp.lt.s32.totalorder %s3524_s7, %s2847_s10 }
 0x204   : > { %v1733_v60 = vpop.permute.xlu1 %1732  ;;  %v1725_v62 = vpop.permute.xlu0 %1724  ;;  %p2850_p7 = scmp.lt.s32.totalorder %s2848_s11, %s2842_s4 }
 0x205   : > { %v1768_v2 = vadd.f32 %v1766_v24, %v1744_v57  ;;  %v1760_v3 = vadd.f32 %v1758_v25, %v1740_v58  ;;  %v1735_v4 = vadd.f32 %v1733_v60, %v1703_v55  ;;  %v1727_v7 = vadd.f32 %v1725_v62, %v1695_v56 }
 0x206   : > { %v1832_v25 = vmul.f32 %v1831_v23, %v3360_v20  ;;  %v1909_v56 = vmul.f32 %v1908_v41, %v3342_v1  ;;  %v1986_v62 = vmul.f32 %v1985_v48, %v3388_v46  ;;  %p2851_p3 = por %p2850_p7, %p2849_p11 }
 0x207   : > { %v1752_v12 = vadd.f32 %v1751_v59, %v1735_v4  ;;  %v1748_v13 = vadd.f32 %v1747_v61, %v1727_v7  ;;  %v1800_v16 = vadd.f32 %v1798_v36, %v1768_v2  ;;  %v1792_v17 = vadd.f32 %v1790_v37, %v1760_v3 }
 0x208   : > { %v1928_v18 = vpop.permute.xlu1 %1927  ;;  %v1920_v19 = vpop.permute.xlu0 %1919  ;;  %v1982_v2 = vmul.f32 %v1981_v49, %v3388_v46  ;;  %p2852_p8 = pnand %p2851_p3, %p2845_p6 }
 0x209   : > { %v1784_v26 = vadd.f32 %v1782_v33, %v1752_v12  ;;  %v1776_v63 = vadd.f32 %v1774_v15, %v1748_v13  ;;  %v1825_v31 = vadd.f32 %v1824_v10, %v1800_v16  ;;  %v1821_v0 = vadd.f32 %v1820_v11, %v1792_v17 }
 0x20a   : > { %v1993_v13 = vstv %s3500_s19  ;;  %v1989_v16 = vstv %s3502_s28 }
 0x20b   : > { %v1816_v24 = vadd.f32 %v1814_v5, %v1784_v26  ;;  %v1808_v27 = vadd.f32 %v1806_v8, %v1776_v63  ;;  %v1904_v8 = vstv %s2420_s20  ;;  %v1990_v63 = vmul.f32 %v1989_v16, %v3388_v46 }
 0x20c   : > { %v1944_v29 = vpop.permute.xlu1 %1943  ;;  %v1936_v30 = vpop.permute.xlu0 %1935  ;;  %v1905_v42 = vmul.f32 %v1904_v8, %v3342_v1  ;;  %v2070_v8 = vstv %s2445_s6 }
 0x20d   : > { %v1833_v32 = vadd.f32 %v1832_v25, %v1816_v24  ;;  %v1829_v14 = vadd.f32 %v1828_v28, %v1808_v27 }
 0x210   : > { %v1960_v34 = vpop.permute.xlu1 %1959  ;;  %v1952_v35 = vpop.permute.xlu0 %1951 }
 0x214   : > { %v1976_v36 = vpop.permute.xlu1 %1975  ;;  %v1968_v37 = vpop.permute.xlu0 %1967 }
 0x218   : > { %v1847_v33 = vpop.permute.xlu1 %1846  ;;  %v1839_v15 = vpop.permute.xlu0 %1838 }
 0x219   : > { %v1849_v39 = vadd.f32 %v1847_v33, %v1825_v31  ;;  %v1841_v21 = vadd.f32 %v1839_v15, %v1821_v0 }
 0x21c   : > { %v1863_v5 = vpop.permute.xlu1 %1862  ;;  %v1855_v20 = vpop.permute.xlu0 %1854 }
 0x21d   : > { %v1865_v51 = vadd.f32 %v1863_v5, %v1833_v32  ;;  %v1857_v52 = vadd.f32 %v1855_v20, %v1829_v14  ;;  %v2066_v32 = vstv %s2444_s21  ;;  %v2062_v14 = vstv %s2443_s23 }
 0x21e   : > { %v2063_v15 = vmul.f32 %v2062_v14, %v3378_v38  ;;  %v2074_v20 = vstv %s2446_s29 }
 0x21f   : > { %v2075_v41 = vmul.f32 %v2074_v20, %v3378_v38 }
 0x220   : > { %v1879_v47 = vpop.permute.xlu1 %1878  ;;  %v1871_v22 = vpop.permute.xlu0 %1870 }
 0x221   : > { %v1881_v43 = vadd.f32 %v1879_v47, %v1849_v39  ;;  %v1873_v45 = vadd.f32 %v1871_v22, %v1841_v21 }
 0x223   : > { %v1906_v53 = vadd.f32 %v1905_v42, %v1881_v43  ;;  %v1902_v54 = vadd.f32 %v1901_v44, %v1873_v45  ;;  %v2071_v43 = vmul.f32 %v2070_v8, %v3378_v38 }
 0x224   : > { %v1895_v55 = vpop.permute.xlu1 %1894  ;;  %v1887_v57 = vpop.permute.xlu0 %1886 }
 0x225   : > { %v1930_v58 = vadd.f32 %v1928_v18, %v1906_v53  ;;  %v1922_v59 = vadd.f32 %v1920_v19, %v1902_v54  ;;  %v1897_v60 = vadd.f32 %v1895_v55, %v1865_v51  ;;  %v1889_v61 = vadd.f32 %v1887_v57, %v1857_v52 }
 0x226   : > { %v1994_v19 = vmul.f32 %v1993_v13, %v3388_v46  ;;  %v2067_v46 = vmul.f32 %v2066_v32, %v3378_v38 }
 0x227   : > { %v1914_v3 = vadd.f32 %v1913_v6, %v1897_v60  ;;  %v1910_v4 = vadd.f32 %v1909_v56, %v1889_v61  ;;  %v1962_v7 = vadd.f32 %v1960_v34, %v1930_v58  ;;  %v1954_v10 = vadd.f32 %v1952_v35, %v1922_v59 }
 0x228   : > { %v2090_v11 = vpop.permute.xlu1 %2089  ;;  %v2082_v12 = vpop.permute.xlu0 %2081 }
 0x229   : > { %v1946_v17 = vadd.f32 %v1944_v29, %v1914_v3  ;;  %v1938_v23 = vadd.f32 %v1936_v30, %v1910_v4  ;;  %v1987_v1 = vadd.f32 %v1986_v62, %v1962_v7  ;;  %v1983_v50 = vadd.f32 %v1982_v2, %v1954_v10 }
 0x22b   : > { %v1978_v18 = vadd.f32 %v1976_v36, %v1946_v17  ;;  %v1970_v26 = vadd.f32 %v1968_v37, %v1938_v23 }
 0x22c   : > { %v2106_v31 = vpop.permute.xlu1 %2105  ;;  %v2098_v0 = vpop.permute.xlu0 %2097 }
 0x22d   : > { %v1995_v24 = vadd.f32 %v1994_v19, %v1978_v18  ;;  %v1991_v25 = vadd.f32 %v1990_v63, %v1970_v26 }
 0x230   : > { %v2009_v27 = vpop.permute.xlu1 %2008  ;;  %v2001_v28 = vpop.permute.xlu0 %2000 }
 0x231   : > { %v2011_v34 = vadd.f32 %v2009_v27, %v1987_v1  ;;  %v2003_v35 = vadd.f32 %v2001_v28, %v1983_v50 }
 0x234   : > { %v2025_v29 = vpop.permute.xlu1 %2024  ;;  %v2017_v30 = vpop.permute.xlu0 %2016 }
 0x235   : > { %v2027_v9 = vadd.f32 %v2025_v29, %v1995_v24  ;;  %v2019_v39 = vadd.f32 %v2017_v30, %v1991_v25 }
 0x238   : > { %v2041_v36 = vpop.permute.xlu1 %2040  ;;  %v2033_v37 = vpop.permute.xlu0 %2032 }
 0x239   : > { %v2043_v33 = vadd.f32 %v2041_v36, %v2011_v34  ;;  %v2035_v5 = vadd.f32 %v2033_v37, %v2003_v35 }
 0x23b   : > { %v2068_v21 = vadd.f32 %v2067_v46, %v2043_v33  ;;  %v2064_v47 = vadd.f32 %v2063_v15, %v2035_v5 }
 0x23c   : > { %v2057_v22 = vpop.permute.xlu1 %2056  ;;  %v2049_v40 = vpop.permute.xlu0 %2048 }
 0x23d   : > { %v2059_v42 = vadd.f32 %v2057_v22, %v2027_v9  ;;  %v2051_v44 = vadd.f32 %v2049_v40, %v2019_v39  ;;  %v2092_v49 = vadd.f32 %v2090_v11, %v2068_v21  ;;  %v2084_v51 = vadd.f32 %v2082_v12, %v2064_v47 }
 0x23f   : > { %v2076_v45 = vadd.f32 %v2075_v41, %v2059_v42  ;;  %v2072_v48 = vadd.f32 %v2071_v43, %v2051_v44 }
 0x240   : > { %v2122_v52 = vpop.permute.xlu1 %2121  ;;  %v2114_v53 = vpop.permute.xlu0 %2113 }
 0x241   : > { %v2124_v54 = vadd.f32 %v2122_v52, %v2092_v49  ;;  %v2116_v6 = vadd.f32 %v2114_v53, %v2084_v51  ;;  %v2108_v38 = vadd.f32 %v2106_v31, %v2076_v45  ;;  %v2100_v55 = vadd.f32 %v2098_v0, %v2072_v48 }
 0x243   : > { %2455 = vst.msk [vmem:[%s229_s30 + $0x8] sm:$0xff] %vm2141_vm7, %v2124_v54  ;;  %2142 = vst.msk [vmem:[%s229_s30] sm:$0xff] %vm2141_vm7, %v2116_v6 }
 0x244   : > { %v2138_v56 = vpop.permute.xlu1 %2137  ;;  %v2130_v57 = vpop.permute.xlu0 %2129 }
 0x245   : > { %v2140_v58 = vadd.f32 %v2138_v56, %v2108_v38  ;;  %v2132_v59 = vadd.f32 %v2130_v57, %v2100_v55 }
 0x247   : > { %2457 = vst.msk [vmem:[%s229_s30 + $0x18] sm:$0xff] %vm2141_vm7, %v2140_v58  ;;  %2456 = vst.msk [vmem:[%s229_s30 + $0x10] sm:$0xff] %vm2141_vm7, %v2132_v59 }
 0x248   : > { %2855 = shalt.err (!%p2852_p8)
}
 0x249   : > { %s2856_s19 = scalar_lea.hbm %s3530_s27, 512  ;;  %s2860_s23 = scalar_lea.hbm %s3584_s3, 1024 }
 0x24a   : > { %p2857_p13 = scmp.ne.s32.totalorder %s3530_s27, %s2856_s19  ;;  %p2861_p12 = scmp.lt.u32.totalorder %s3530_s27, %s3584_s3 }
 0x24b   : > { %p2862_p2 = scmp.lt.u32.totalorder %s2860_s23, %s2856_s19  ;;  %p2864_p5 = scmp.lt.u32.totalorder %s2856_s19, %s3530_s27 }
 0x24c   : > { %p2858_p4 = pnand %p2857_p13, %p3605_p0 }
 0x24d   : > { %p2863_p9 = por %p2862_p2, %p2861_p12 }
 0x24e   : > { %p2859_p10 = pneg %p2858_p4 }
 0x24f   : > { %p2865_p1 = por %p2864_p5, %p2863_p9 }
 0x251   : > { %p2866_p6 = pnand %p2865_p1, %p2859_p10 }
 0x253   : > { %2869 = shalt.err (!%p2866_p6)
}
 0x254   : > { %s2946_s30 = smov 128   ;;  %s2947_s9 = smov 8  }
 0x255   : > { %2699 = dma.vmem_to_hbm [thread:$0]  (%p3605_p0), %s3524_s7, 512, %s3530_s27, %s2150_s15, %s2946_s30, %s2946_s30, %s2947_s9  }
 0x256 PF: > { %s2179_s22 = sand.u32 1, %s2912_s12   ;;  %p3606_p11 = scmp.ne.s32.totalorder %s3595_s25, 0 }
 0x257   : > { %p3607_p7 = scmp.ge.s32.totalorder %s2932_s17, 2  ;;  %s2180_s20 = scalar_lea.sflag [#allocation5], %s2179_s22 }
 0x259   : > { %p2713_p3 = pnand %p3607_p7, %p3606_p11 }
 0x25b   : > { %2907 = dma.done.wait (!%p2713_p3), %s2180_s20, 512  }
 0x25c   : > { %2909 = vsyncadd (!%p2713_p3), %s2180_s20, 4294966784  ;;  %s21_s17 = sadd.s32 1, %s2932_s17   ;;  %s3608_s12 = smov %s2916_s13 }
 0x25d   : > { %p18_p8 = scmp.ge.s32.totalorder %s21_s17, 4   ;;  %s3609_s13 = smov %s2920_s14 }
 0x25e   : > { %s3610_s14 = smov %s3079_s8  ;;  %s3611_s15 = smov %s2928_s16 }
 0x25f   : > { %s3612_s16 = smov %s3614_s18  ;;  %20 = sbr.rel (!%p18_p8) target bundleno = 8 (0x8), region = 104 }
 0x266   :  { %2185 = vsyncpa [#allocation4], 1 }
 0x267   :  { %2187 = vsyncpa [#allocation4 + $0x1], 1 }
 0x268   :  { %2188 = vsyncpa [#allocation5], 1 }
 0x269   :  { %2190 = vsyncpa [#allocation5 + $0x1], 1 }
 0x26a   :  { %2191 = vsyncpa [#allocation6], 1 }
 0x26b   :  { %2193 = vsyncpa [#allocation6 + $0x1], 1 }
 0x26c   :  { %2194 = vsyncpa [#allocation9], 1 }

</bundles_post_ra>
